<compile_context>
chip_gen: v6e
topology: v6e:2x2x1
jax: 0.10.0
libtpu: 0.0.40
codegen_flags: <defaults>
</compile_context>

<pallas_src>
import functools
import math

import jax
import jax.numpy as jnp
from jax.experimental import pallas as pl
from jax.experimental.pallas import tpu as pltpu


def _round_up(x, m):
    return ((x + m - 1) // m) * m


def _f2g_kernel(x_ref, pf_ref, w_ref, mask_ref, out_ref, acc_ref, *, use_bf16):
    # x_ref:    (1, C, tHW)        current batch element, HW tile (lane axis = HW)
    # pf_ref:   (C, nodes_p)       pre_fea, node axis padded to a multiple of 8
    # w_ref:    (C, hidden_p)      weight, hidden padded to a multiple of 128 (single block)
    # mask_ref: (nodes_p, 1)       0 for real nodes, -1e30 for padded node rows
    # out_ref:  (1, nodes_p, hidden_p)
    # acc_ref:  (nodes_p, hidden_p) f32 accumulator over the HW reduction axis
    k = pl.program_id(1)

    @pl.when(k == 0)
    def _init():
        acc_ref[...] = jnp.zeros_like(acc_ref)

    x = x_ref[0]          # (C, tHW)
    pf = pf_ref[...]      # (C, nodes_p)
    w = w_ref[...]        # (C, hidden_p)

    if use_bf16:
        # In-kernel cast only (no extra HBM pass); softmax + accumulation stay f32.
        x_mm = x.astype(jnp.bfloat16)
        pf_mm = pf.astype(jnp.bfloat16)
        w_mm = w.astype(jnp.bfloat16)
        prec = None
    else:
        x_mm, pf_mm, w_mm = x, pf, w
        prec = jax.lax.Precision.HIGHEST   # full f32 MXU contraction

    # feaT = pre_fea^T @ x -> (nodes_p, tHW); contraction over the leading C axis
    # uses the MXU transposed-LHS path (no materialized transpose).
    fea = jax.lax.dot_general(pf_mm, x_mm, (((0,), (0,)), ((), ())),
                              preferred_element_type=jnp.float32,
                              precision=prec)

    # Padded node rows get -1e30 so they vanish from the softmax denominator.
    fea = fea + mask_ref[...]

    # Numerically stable softmax over the node (sublane) axis, kept in f32.
    fea = fea - jnp.max(fea, axis=0, keepdims=True)
    fea = jnp.exp(fea)
    fea = fea / jnp.sum(fea, axis=0, keepdims=True)   # exact divide (denominator >= 1)

    # weight_node^T path: wn = x^T @ weight -> (tHW, hidden_p).
    wn = jax.lax.dot_general(x_mm, w_mm, (((0,), (0,)), ((), ())),
                             preferred_element_type=jnp.float32,
                             precision=prec)

    # Partial graph contribution for this HW tile: (nodes_p, tHW) @ (tHW, hidden_p).
    # fea / wn stay in f32 (no bf16 recast) while the kernel is HBM-bound.
    acc_ref[...] += jax.lax.dot_general(
        fea, wn, (((1,), (0,)), ((), ())),
        preferred_element_type=jnp.float32,
        precision=jax.lax.Precision.HIGHEST)

    @pl.when(k == pl.num_programs(1) - 1)
    def _finalize():
        out_ref[0] = jnp.maximum(acc_ref[...], 0.0).astype(out_ref.dtype)


def featuremaps_to_graph(x_nchw, pre_fea, weight, *, max_hw_tile=2048,
                         use_bf16=False):
    """x_nchw: (N, C, H, W); pre_fea: (C, nodes); weight: (C, hidden)."""
    n, c, h, w = x_nchw.shape
    hw = h * w
    c_pf, nodes = pre_fea.shape
    c_w, hidden = weight.shape
    assert c_pf == c and c_w == c

    out_dtype = x_nchw.dtype

    # NCHW -> (N, C, HW): pure reshape, no HBM transpose pass before the kernel.
    x = x_nchw.reshape(n, c, hw)

    nodes_p = _round_up(nodes, 8)      # sublane-friendly node axis
    hidden_p = _round_up(hidden, 128)  # lane-dense output stores

    pf_p = jnp.pad(pre_fea, ((0, 0), (0, nodes_p - nodes)))
    w_p = jnp.pad(weight, ((0, 0), (0, hidden_p - hidden)))

    # Additive logits mask for padded node rows (tiny input; avoids per-step iota+select).
    node_mask = jnp.concatenate(
        [jnp.zeros((nodes, 1), jnp.float32),
         jnp.full((nodes_p - nodes, 1), -1e30, jnp.float32)], axis=0)

    # ---- Generation-aware VMEM budgeting ------------------------------------
    try:
        phys_vmem = int(pltpu.get_tpu_info().vmem_capacity_bytes)
    except Exception:  # no TPU visible (e.g. interpret on CPU) -> conservative
        phys_vmem = 64 * 1024 * 1024
    if phys_vmem >= 100 * 1024 * 1024:       # v5e / v6e: 128 MiB physical VMEM
        vmem_limit = 64 * 1024 * 1024
        work_budget = 40 * 1024 * 1024
    else:                                    # v7x: 64 MiB physical VMEM
        vmem_limit = 32 * 1024 * 1024
        work_budget = 20 * 1024 * 1024

    # hidden stays a SINGLE block: tiling hidden would re-read x once per tile on an
    # HBM-bound op.  Only the HW tile shrinks when VMEM gets tight.
    itemsize = 4  # f32 compute path; x stays f32 in HBM even when use_bf16=True
    fixed_bytes = (nodes_p * hidden_p + 2 * c * hidden_p + 2 * c * nodes_p) * itemsize
    per_col_bytes = (2 * c + hidden_p + 2 * nodes_p) * itemsize
    cap = max(128, ((work_budget - fixed_bytes) // max(per_col_bytes, 1)) // 128 * 128)

    hw_aligned = _round_up(hw, 128)
    t_hw = min(hw_aligned, cap, max(128, (max_hw_tile // 128) * 128))
    hw_p = _round_up(hw, t_hw)

    if hw_p != hw:
        # Zero-padded HW columns contribute exactly zero to the graph accumulation
        # (their weight_node rows are zero), so padding is semantics-preserving.
        x = jnp.pad(x, ((0, 0), (0, 0), (0, hw_p - hw)))

    grid = (n, hw_p // t_hw)  # (batch, HW reduction)

    kernel = functools.partial(_f2g_kernel, use_bf16=use_bf16)

    out = pl.pallas_call(
        kernel,
        out_shape=jax.ShapeDtypeStruct((n, nodes_p, hidden_p), out_dtype),
        grid=grid,
        in_specs=[
            pl.BlockSpec((1, c, t_hw), lambda b, k: (b, 0, k)),
            pl.BlockSpec((c, nodes_p), lambda b, k: (0, 0)),
            pl.BlockSpec((c, hidden_p), lambda b, k: (0, 0)),
            pl.BlockSpec((nodes_p, 1), lambda b, k: (0, 0)),
        ],
        out_specs=pl.BlockSpec((1, nodes_p, hidden_p), lambda b, k: (b, 0, 0)),
        scratch_shapes=[pltpu.VMEM((nodes_p, hidden_p), jnp.float32)],
        compiler_params=pltpu.CompilerParams(
            dimension_semantics=("parallel", "arbitrary"),
            vmem_limit_bytes=vmem_limit,
        ),
    )(x, pf_p, w_p, node_mask)

    # Strip node / hidden padding (tiny slice, pure layout).
    return out[:, :nodes, :hidden]


def xavier_uniform(key, shape, dtype=jnp.float32):
    fan_in, fan_out = shape
    bound = math.sqrt(6.0 / (fan_in + fan_out))
    return jax.random.uniform(key, shape, dtype, minval=-bound, maxval=bound)


def _reference(x_nchw, pre_fea, weight):
    n, c, h, w = x_nchw.shape
    hp = jax.lax.Precision.HIGHEST
    x = jnp.transpose(x_nchw.reshape(n, c, h * w), (0, 2, 1))   # (N, HW, C)
    fea = jax.nn.softmax(jnp.einsum("bpc,cn->bpn", x, pre_fea, precision=hp), axis=-1)
    wn = jnp.einsum("bpc,ch->bph", x, weight, precision=hp)
    return jax.nn.relu(jnp.einsum("bpn,bph->bnh", fea, wn, precision=hp))


if __name__ == "__main__":
    # Small shapes consistent with the module:
    #   batch=2, input_channels=4, spatial=16x16, hidden_layers=32, nodes=7
    N, C, H, W = 2, 4, 16, 16
    HIDDEN, NODES = 32, 7

    key = jax.random.PRNGKey(0)
    kx, kpf, kw = jax.random.split(key, 3)

    x = jax.random.normal(kx, (N, C, H, W), dtype=jnp.float32)
    pre_fea = xavier_uniform(kpf, (C, NODES))
    weight = xavier_uniform(kw, (C, HIDDEN))

    ref = _reference(x, pre_fea, weight)

    # Default tiling (single HW block at these small shapes).
    out = jax.block_until_ready(featuremaps_to_graph(x, pre_fea, weight))
    assert out.shape == (N, NODES, HIDDEN)
    assert jnp.allclose(out, ref, atol=2e-3, rtol=2e-3), "mismatch vs reference"

    # Also exercise the HW-tiled accumulation path (2 reduction steps of 128).
    out_tiled = jax.block_until_ready(
        featuremaps_to_graph(x, pre_fea, weight, max_hw_tile=128))
    assert jnp.allclose(out_tiled, ref, atol=2e-3, rtol=2e-3), \
        "mismatch vs reference (tiled HW reduction)"

    print("KERNEL_OK")
</pallas_src>

<mosaic_0001>
module attributes {stable_mosaic.version = 11 : i64} {
  func.func @_f2g_kernel(%arg0: i32, %arg1: i32, %arg2: memref<1x4x256xf32, #tpu.memory_space<vmem>>, %arg3: memref<4x8xf32, #tpu.memory_space<vmem>>, %arg4: memref<4x128xf32, #tpu.memory_space<vmem>>, %arg5: memref<8x1xf32, #tpu.memory_space<vmem>>, %arg6: memref<1x8x128xf32, #tpu.memory_space<vmem>>, %arg7: memref<8x128xf32, #tpu.memory_space<vmem>>) attributes {dimension_semantics = [#tpu.dimension_semantics<parallel>, #tpu.dimension_semantics<arbitrary>], iteration_bounds = array<i64: 2, 1>, scalar_prefetch = 0 : i64, scratch_operands = 1 : i64, tpu.core_type = #tpu.core_type<tc>, window_params = [{transform_indices = @transform_0, window_bounds = array<i64: 1, 4, 256>}, {pipeline_mode = #tpu.pipeline_mode<synchronous>, transform_indices = @transform_1, window_bounds = array<i64: 4, 8>}, {pipeline_mode = #tpu.pipeline_mode<synchronous>, transform_indices = @transform_2, window_bounds = array<i64: 4, 128>}, {pipeline_mode = #tpu.pipeline_mode<synchronous>, transform_indices = @transform_3, window_bounds = array<i64: 8, 1>}, {transform_indices = @transform_4, window_bounds = array<i64: 1, 8, 128>}]} {
    %c0_i32 = arith.constant 0 : i32
    %0 = arith.cmpi eq, %arg1, %c0_i32 : i32
    %1 = arith.extui %0 : i1 to i32
    %c0_i32_0 = arith.constant 0 : i32
    %2 = arith.cmpi ne, %1, %c0_i32_0 : i32
    scf.if %2 {
      %cst_19 = arith.constant 0.000000e+00 : f32
      %28 = vector.broadcast %cst_19 : f32 to vector<8x128xf32>
      %c0_20 = arith.constant 0 : index
      %c0_21 = arith.constant 0 : index
      %29 = vector.load %arg7[%c0_20, %c0_21] : memref<8x128xf32, #tpu.memory_space<vmem>>, vector<8x128xf32>
      tpu.vector_store %arg7[%c0_20, %c0_21], %28 {strides = array<i32>} : memref<8x128xf32, #tpu.memory_space<vmem>>, vector<8x128xf32>,
    } else {
    }
    %c0 = arith.constant 0 : index
    %c0_1 = arith.constant 0 : index
    %c0_2 = arith.constant 0 : index
    %3 = vector.load %arg2[%c0, %c0_1, %c0_2] : memref<1x4x256xf32, #tpu.memory_space<vmem>>, vector<1x4x256xf32>
    %4 = vector.shape_cast %3 : vector<1x4x256xf32> to vector<4x256xf32>
    %c0_3 = arith.constant 0 : index
    %c0_4 = arith.constant 0 : index
    %5 = vector.load %arg3[%c0_3, %c0_4] : memref<4x8xf32, #tpu.memory_space<vmem>>, vector<4x8xf32>
    %c0_5 = arith.constant 0 : index
    %c0_6 = arith.constant 0 : index
    %6 = vector.load %arg4[%c0_5, %c0_6] : memref<4x128xf32, #tpu.memory_space<vmem>>, vector<4x128xf32>
    %cst = arith.constant dense<0.000000e+00> : vector<8x256xf32>
    %7 = tpu.matmul %5, %4, %cst {dimension_numbers = #tpu.dot_dimension_numbers<[0], [0], [1], [1], [0, 1, 1, 1], [], []>, precision = #tpu.contract_precision<fp32>} : vector<4x8xf32>, vector<4x256xf32>, vector<8x256xf32> -> vector<8x256xf32>
    %c0_7 = arith.constant 0 : index
    %c0_8 = arith.constant 0 : index
    %8 = vector.load %arg5[%c0_7, %c0_8] : memref<8x1xf32, #tpu.memory_space<vmem>>, vector<8x1xf32>
    %9 = vector.broadcast %8 : vector<8x1xf32> to vector<8x256xf32>
    %10 = arith.addf %7, %9 : vector<8x256xf32>
    %cst_9 = arith.constant dense<0xFF800000> : vector<256xf32>
    %11 = vector.multi_reduction <maximumf>, %10, %cst_9 [0] : vector<8x256xf32> to vector<256xf32>
    %12 = vector.shape_cast %11 : vector<256xf32> to vector<1x256xf32>
    %13 = vector.broadcast %12 : vector<1x256xf32> to vector<8x256xf32>
    %14 = arith.subf %10, %13 : vector<8x256xf32>
    %15 = math.exp %14 : vector<8x256xf32>
    %cst_10 = arith.constant dense<0.000000e+00> : vector<256xf32>
    %16 = vector.multi_reduction <add>, %15, %cst_10 [0] : vector<8x256xf32> to vector<256xf32>
    %17 = vector.shape_cast %16 : vector<256xf32> to vector<1x256xf32>
    %18 = vector.broadcast %17 : vector<1x256xf32> to vector<8x256xf32>
    %19 = arith.divf %15, %18 : vector<8x256xf32>
    %cst_11 = arith.constant dense<0.000000e+00> : vector<256x128xf32>
    %20 = tpu.matmul %4, %6, %cst_11 {dimension_numbers = #tpu.dot_dimension_numbers<[0], [0], [1], [1], [0, 1, 1, 1], [], []>, precision = #tpu.contract_precision<fp32>} : vector<4x256xf32>, vector<4x128xf32>, vector<256x128xf32> -> vector<256x128xf32>
    %c0_12 = arith.constant 0 : index
    %c0_13 = arith.constant 0 : index
    %21 = vector.load %arg7[%c0_12, %c0_13] : memref<8x128xf32, #tpu.memory_space<vmem>>, vector<8x128xf32>
    %cst_14 = arith.constant dense<0.000000e+00> : vector<8x128xf32>
    %22 = tpu.matmul %19, %20, %cst_14 {dimension_numbers = #tpu.dot_dimension_numbers<[1], [0], [0], [1], [0, 0, 1, 1], [], []>, precision = #tpu.contract_precision<fp32>} : vector<8x256xf32>, vector<256x128xf32>, vector<8x128xf32> -> vector<8x128xf32>
    %23 = arith.addf %21, %22 : vector<8x128xf32>
    %c0_15 = arith.constant 0 : index
    %c0_16 = arith.constant 0 : index
    %24 = vector.load %arg7[%c0_15, %c0_16] : memref<8x128xf32, #tpu.memory_space<vmem>>, vector<8x128xf32>
    tpu.vector_store %arg7[%c0_15, %c0_16], %23 {strides = array<i32>} : memref<8x128xf32, #tpu.memory_space<vmem>>, vector<8x128xf32>,
    %c0_i32_17 = arith.constant 0 : i32
    %25 = arith.cmpi eq, %arg1, %c0_i32_17 : i32
    %26 = arith.extui %25 : i1 to i32
    %c0_i32_18 = arith.constant 0 : i32
    %27 = arith.cmpi ne, %26, %c0_i32_18 : i32
    scf.if %27 {
      %c0_19 = arith.constant 0 : index
      %c0_20 = arith.constant 0 : index
      %28 = vector.load %arg7[%c0_19, %c0_20] : memref<8x128xf32, #tpu.memory_space<vmem>>, vector<8x128xf32>
      %cst_21 = arith.constant 0.000000e+00 : f32
      %29 = vector.broadcast %cst_21 : f32 to vector<8x128xf32>
      %30 = arith.maximumf %28, %29 : vector<8x128xf32>
      %c0_22 = arith.constant 0 : index
      %c0_23 = arith.constant 0 : index
      %c0_24 = arith.constant 0 : index
      %31 = vector.load %arg6[%c0_22, %c0_23, %c0_24] : memref<1x8x128xf32, #tpu.memory_space<vmem>>, vector<1x8x128xf32>
      %32 = vector.shape_cast %31 : vector<1x8x128xf32> to vector<8x128xf32>
      %33 = vector.shape_cast %30 : vector<8x128xf32> to vector<1x8x128xf32>
      tpu.vector_store %arg6[%c0_22, %c0_23, %c0_24], %33 {strides = array<i32>} : memref<1x8x128xf32, #tpu.memory_space<vmem>>, vector<1x8x128xf32>,
    } else {
    }
    return
  }
  func.func @transform_0(%arg0: i32, %arg1: i32) -> (i32, i32, i32) {
    %c0_i32 = arith.constant 0 : i32
    %c0_i32_0 = arith.constant 0 : i32
    return %arg0, %c0_i32, %arg1 : i32, i32, i32
  }
  func.func @transform_1(%arg0: i32, %arg1: i32) -> (i32, i32) {
    %c0_i32 = arith.constant 0 : i32
    %c0_i32_0 = arith.constant 0 : i32
    %c0_i32_1 = arith.constant 0 : i32
    return %c0_i32, %c0_i32_0 : i32, i32
  }
  func.func @transform_2(%arg0: i32, %arg1: i32) -> (i32, i32) {
    %c0_i32 = arith.constant 0 : i32
    %c0_i32_0 = arith.constant 0 : i32
    %c0_i32_1 = arith.constant 0 : i32
    return %c0_i32, %c0_i32_0 : i32, i32
  }
  func.func @transform_3(%arg0: i32, %arg1: i32) -> (i32, i32) {
    %c0_i32 = arith.constant 0 : i32
    %c0_i32_0 = arith.constant 0 : i32
    %c0_i32_1 = arith.constant 0 : i32
    return %c0_i32, %c0_i32_0 : i32, i32
  }
  func.func @transform_4(%arg0: i32, %arg1: i32) -> (i32, i32, i32) {
    %c0_i32 = arith.constant 0 : i32
    %c0_i32_0 = arith.constant 0 : i32
    %c0_i32_1 = arith.constant 0 : i32
    return %arg0, %c0_i32, %c0_i32_0 : i32, i32, i32
  }
}

</mosaic_0001>

<bundles_post_ra>
// kernel: tpu_custom_call.1
= control target key start
LH: loop header
LB: loop body
LE: loop exit
PB: predicated region body
PF: predicated region fallthrough
CT: control target
= control target key end

     0   :  { %9 = vsyncpa [#allocation4], 0  ;;  %s6194_s0 = inlined_call_operand.hbm [shape: f32[2,4,256], index: 0, kind: input, shape index: {}]   ;;  %s6195_s1 = inlined_call_operand.vmem [shape: f32[4,8], index: 1, kind: input, shape index: {}]   ;;  %s6196_s2 = inlined_call_operand.vmem [shape: f32[4,128], index: 2, kind: input, shape index: {}]   ;;  %s6197_s3 = inlined_call_operand.vmem [shape: f32[8,1], index: 3, kind: input, shape index: {}]   ;;  %s6198_s4 = inlined_call_operand.hbm [shape: f32[2,8,128], index: 4, kind: output, shape index: {}]  }
   0x1   :  { %11 = vsyncpa [#allocation4 + $0x1], 0 }
   0x2   :  { %12 = vsyncpa [#allocation5], 0 }
   0x3   :  { %14 = vsyncpa [#allocation5 + $0x1], 0  ;;  %s4633_s15 = smov 0   ;;  %s4635_s16 = smov 0  }
   0x4   :  { %s4637_s17 = smov 0   ;;  %s4639_s18 = smov 0  }
   0x5   :  { %s4641_s19 = smov 0   ;;  %s4643_s20 = smov 0  }
   0x6 LB: > { %s3696_s21 = sadd.s32 4294967295, %s4602_s20   ;;  %s3697_s22 = sadd.s32 4294967294, %s4602_s20   ;;  %s4602_s20 = sphi %s4643_s20, %s20_s20   ;;  %s4598_s19 = sphi %s4641_s19, %s6539_s19   ;;  %s4594_s18 = sphi %s4639_s18, %s6538_s18   ;;  %s4590_s17 = sphi %s4637_s17, %s6537_s17   ;;  %s4586_s16 = sphi %s4635_s16, %s6536_s16   ;;  %s4582_s15 = sphi %s4633_s15, %s6535_s15  }
   0x7   : > { %s32_s23 = sadd.s32 1, %s4598_s19  ;;  %s41_s24 = sadd.s32 1, %s4590_s17 }
   0x8   : > { %p34_p0 = scmp.ge.s32.totalorder %s32_s23, 2  ;;  %p48_p1 = scmp.ne.s32.totalorder %s4590_s17, %s4586_s16 }
   0x9   : > { %p49_p2 = scmp.eq.s32.totalorder %s4602_s20, 0  ;;  %p54_p3 = scmp.ne.s32.totalorder %s4586_s16, %s4582_s15 }
   0xa   : > { %s6541_s23 = smov (%p34_p0, %s32_s23), 0  ;;  %p55_p5 = scmp.eq.s32.totalorder %s3696_s21, 0 }
   0xb   : > { %p4674_p4 = por %p49_p2, %p48_p1  ;;  %s36_s26 = ssub.s32 %s4598_s19, %s6541_s23 }
   0xc   : > { %p141_p6 = scmp.eq.s32.totalorder %s3696_s21, 1  ;;  %p39_p7 = scmp.eq.s32.totalorder %s36_s26, 0 }
   0xd   : > { %p4680_p8 = por %p55_p5, %p54_p3  ;;  %p147_p10 = scmp.eq.s32.totalorder %s3697_s22, 1 }
   0xe   : > { %p4684_p9 = por %p141_p6, %p48_p1  ;;  %p4431_p13 = scmp.lt.s32.totalorder %s4602_s20, 2 }
   0xf   : > { %s4689_s29 = scalar_select %p39_p7, %s4590_s17, %s41_s24  }
  0x10   : > { %p4691_p11 = por %p147_p10, %p54_p3  ;;  %s176_s5 = sand.u32 1, %s4590_s17  }
  0x11   : > { %s3700_s6 = sshll.u32 %s176_s5, 3  ;;  %s3710_s7 = sshll.u32 %s4598_s19, 7 }
  0x12   : > { %s6309_s30 = scalar_select %p4691_p11, 1, 0 }
  0x13   : > { %s188_s10 = scalar_lea.hbm %s6194_s0, %s3710_s7  ;;  %s180_s11 = scalar_lea.vmem [#allocation3], %s3700_s6 }
  0x14   : > { %s190_s12 = sshll.u32 %s180_s11, 4  ;;  %p4704_p0 = pnand %p4431_p13, %p4674_p4  ;;  %s191_s12 = int_to_ptr.vmem [resolvable:$true] %s190_s12 }
  0x15   : > { %p3703_p1 = scmp.ge.s32.totalorder %s4602_s20, 1  ;;  %p195_p2 = scmp.lt.s32.totalorder %s4602_s20, 3 }
  0x16   : > { %s177_s14 = scalar_lea.sflag [#allocation4], %s176_s5  ;;  %p4496_p3 = pneg %p4704_p0 }
  0x17   : > { %s4507_s21 = scalar_lea.vmem %s191_s12, 128  ;;  %s4604_s22 = smov [#allocation3]  }
  0x18   : > { %p4508_p5 = scmp.ne.s32.totalorder %s191_s12, %s4507_s21  ;;  %s4512_s24 = sshll.u32 %s4604_s22, 4  ;;  %s4513_s24 = int_to_ptr.vmem [resolvable:$false] %s4512_s24 }
  0x19   : > { %s4514_s26 = scalar_lea.vmem %s4513_s24, 256  ;;  %p4515_p10 = scmp.lt.s32.totalorder %s191_s12, %s4513_s24 }
  0x1a   : > { %p4510_p6 = pnand %p4508_p5, %p4496_p3  ;;  %p4516_p12 = scmp.lt.s32.totalorder %s4514_s26, %s4507_s21 }
  0x1c   : > { %p4511_p7 = pneg %p4510_p6  ;;  %p4517_p4 = por %p4516_p12, %p4515_p10 }
  0x1e   : > { %p4518_p13 = pnand %p4517_p4, %p4511_p7 }
  0x20   : > { %4521 = shalt.err (!%p4518_p13)
}
  0x21   : > { %4426 = dma.hbm_to_vmem [thread:$0]  (!%p4704_p0), %s188_s10, 128, %s191_s12, %s177_s14  }
  0x22   : > { %p196_p11 = pnand %p3703_p1, %p195_p2 }
  0x24   : > { %199 = sbr.rel (%p196_p11) target bundleno = 928 (0x3a0), region = 36 }
  0x29   : > { %s4719_s25 = sand.u32 1, %s4586_s16  }
  0x2a   : > { %s3704_s5 = sshll.u32 %s4719_s25, 3  ;;  %s202_s6 = scalar_lea.sflag [#allocation4], %s4719_s25 }
  0x2b   : > { %s205_s7 = scalar_lea.vmem [#allocation3], %s3704_s5 }
  0x2c   : > { %4573 = dma.done.wait (%p4680_p8), %s202_s6, 128  }
  0x2d   : > { %4575 = vsyncadd (%p4680_p8), %s202_s6, 4294967168  ;;  %vm283_vm0 = vcmask 1043456   ;;  %v237_v0 = vld [vmem:[%s6195_s1] sm:$0xf]  ;;  %v4605_v2 = vmov 0.0   ;;  %v4606_v16 = vmov 0  }
  0x2e   : > { %v236_v1 = vld [vmem:[%s205_s7] sm:$0xff]  ;;  %440 = vmatprep.mubr.f32.mxu1 %v4605_v2  ;;  %354 = vmatprep.mubr.f32.mxu0 %v4605_v2  ;;  %vm279_vm1 = vcmask 31744   ;;  %s3707_s13 = sshll.u32 %s4594_s18, 7  ;;  %s229_s14 = scalar_lea.vmem [#allocation6], %s3704_s5 }
  0x2f   : > { %245 = vxpose.xlu0.b32.start.end [1/1] (short) (narrow) %v237_v0, 8  ;;  %v284_v3 = vsel %vm283_vm0, %v236_v1, 0  ;;  %v278_v4 = vcombine.high %v236_v1, %v236_v1  ;;  %v239_v17 = vld [vmem:[%s6197_s3] sm:$0xff]  ;;  %s3615_s21 = sshll.u32 %s229_s14, 4  ;;  %s3613_s26 = scalar_lea.hbm %s6198_s4, %s3707_s13  ;;  %s3616_s21 = int_to_ptr.vmem [resolvable:$true] %s3615_s21 }
  0x30   : > { %v320_v5 = vand.u32 4294901760, %v284_v3  ;;  %v238_v18 = vld [vmem:[%s6196_s2] sm:$0xf]  ;;  %s3602_s6 = scalar_lea.sflag [#allocation5], %s4719_s25  ;;  %s4522_s7 = scalar_lea.vmem %s3616_s21, 128 }
  0x31   : > { %820 = vxpose.xlu1.b32.start.end [1/1] (short) %v278_v4, 128  ;;  %v286_v6 = vsel %vm283_vm0, %v278_v4, 0  ;;  %v949_v19 = vsel %vm283_vm0, %v238_v18, 0  ;;  %p4523_p8 = scmp.ne.s32.totalorder %s3616_s21, %s4522_s7  ;;  %s4607_s8 = smov [#allocation6]  }
  0x32   : > { %v4736_v7 = vsub.f32 %v284_v3, %v320_v5  ;;  %v318_v8 = vand.u32 4294901760, %v286_v6  ;;  %v4754_v20 = vand.u32 4294901760, %v949_v19  ;;  %s4526_s9 = sshll.u32 %s4607_s8, 4  ;;  %s4527_s9 = int_to_ptr.vmem [resolvable:$false] %s4526_s9 }
  0x33   : > { %788 = vxpose.xlu0.b32.start.end [1/1] (short) %v236_v1, 128  ;;  %p4524_p11 = pnand %p4523_p8, %p4684_p9  ;;  %s4528_s18 = scalar_lea.vmem %s4527_s9, 256 }
  0x34   : > { %v4738_v9 = vsub.f32 %v286_v6, %v318_v8  ;;  %v404_v10 = vand.u32 4294901760, %v4736_v7  ;;  %319 = vmatprep.subr.mxu0 %v318_v8  ;;  %v4757_v21 = vsub.f32 %v949_v19, %v4754_v20  ;;  %p4529_p0 = scmp.lt.s32.totalorder %s3616_s21, %s4527_s9  ;;  %p4530_p1 = scmp.lt.s32.totalorder %s4528_s18, %s4522_s7 }
  0x35   : > { %321 = vmatpush1.msra.mxu0 %v320_v5  ;;  %p4525_p12 = pneg %p4524_p11 }
  0x36   : > { %v398_v11 = vand.u32 4294901760, %v4738_v9  ;;  %v405_v12 = vsub.f32 %v4736_v7, %v404_v10  ;;  %480 = vmatprep.subr.mxu0 %v4738_v9  ;;  %v4760_v22 = vand.u32 4294901760, %v4757_v21  ;;  %p4531_p2 = por %p4530_p1, %p4529_p0 }
  0x38   : > { %v399_v13 = vsub.f32 %v4738_v9, %v398_v11  ;;  %v406_v14 = vand.u32 4294901760, %v405_v12  ;;  %v1371_v26 = vsub.f32 %v4757_v21, %v4760_v22  ;;  %p4532_p3 = pnand %p4531_p2, %p4525_p12 }
  0x3a   : > { %v400_v15 = vand.u32 4294901760, %v399_v13  ;;  %v1372_v33 = vand.u32 4294901760, %v1371_v26 }
  0x3c   : > { %401 = vmatprep.subr.mxu1 %v400_v15 }
  0x3d   : > { %407 = vmatpush1.msra.mxu1 %v406_v14 }
  0x3e   : > { %556 = vmatprep.subr.mxu1 %v318_v8 }
  0x4f   : > { %4483 = vset.pattern.permute.xlu1 %v4606_v16 }
  0x5c   : > { %4484 = vset.pattern.permute.xlu0 %v4606_v16 }
  0x8b   : > { %242 = vperm.xlu1 %4483, %v239_v17  }
  0xab   : > { %v261_v23 = vpop.trf.xlu0 }
  0xac   : > { %v281_v24 = vsel %vm279_vm1, %v261_v23, 0 }
  0xad   : > { %v355_v25 = vand.u32 4294901760, %v281_v24  ;;  %v4765_v27 = vpop.trf.xlu1 }
  0xaf   : > { %v356_v28 = vsub.f32 %v281_v24, %v355_v25  ;;  %v804_v29 = vpop.trf.xlu0  ;;  %442 = vmatmul.mubr.f32.vlgmr.msra.gmra.mxu1 %v355_v25 }
  0xb0   : > { %v853_v30 = vsel %vm279_vm1, %v804_v29, 0  ;;  %558 = vmatpush1.msra.mxu1 %v320_v5  ;;  %591 = vmatprep.mubr.f32.mxu1 %v4605_v2 }
  0xb1   : > { %v357_v31 = vand.u32 4294901760, %v356_v28  ;;  %v4769_v32 = vand.u32 4294901760, %v853_v30  ;;  %710 = vmatprep.subr.mxu1 %v318_v8  ;;  %v4771_v34 = vpop.trf.xlu1 }
  0xb3   : > { %v4774_v35 = vsub.f32 %v853_v30, %v4769_v32  ;;  %v805_v36 = vpop.trf.xlu0  ;;  %595 = vmatmul.mubr.f32.vlgmr.msra.gmra.mxu1 %v357_v31  ;;  %v358_v37 = vsub.f32 %v356_v28, %v357_v31 }
  0xb4   : > { %v856_v38 = vsel %vm279_vm1, %v805_v36, 0  ;;  %712 = vmatpush1.msra.mxu1 %v320_v5  ;;  %745 = vmatprep.mubr.f32.mxu1 %v4605_v2 }
  0xb5   : > { %v4778_v39 = vand.u32 4294901760, %v856_v38  ;;  %v359_v40 = vand.u32 4294901760, %v358_v37  ;;  %4169 = vmatprep.subr.mxu1 %v1372_v33  ;;  %v4780_v41 = vpop.trf.xlu1  ;;  %v6213_v42 = vand.u32 4294901760, %v4774_v35 }
  0xb7   : > { %v4784_v43 = vsub.f32 %v856_v38, %v4778_v39  ;;  %v806_v44 = vpop.trf.xlu0  ;;  %360 = vmatmul.mubr.f32.vlgmr.msra.gmra.mxu0 %v359_v40  ;;  %747 = vmatmul.mubr.f32.vlgmr.msra.gmra.mxu1 %v355_v25  ;;  %v1020_v49 = vsub.f32 %v4774_v35, %v6213_v42 }
  0xb8   : > { %v859_v45 = vsel %vm279_vm1, %v806_v44, 0  ;;  %4171 = vmatprep.mubr.f32.mxu1 %v4769_v32  ;;  %483 = vmatpush1.msra.mxu0 %v4736_v7 }
  0xb9   : > { %v6211_v46 = vand.u32 4294901760, %v4784_v43  ;;  %v4790_v47 = vand.u32 4294901760, %v859_v45  ;;  %516 = vmatprep.mubr.f32.mxu0 %v4605_v2  ;;  %4170 = vmatpush3.msra.mxu1 %v1372_v33  ;;  %v4793_v48 = vpop.trf.xlu1  ;;  %v1021_v57 = vand.u32 4294901760, %v1020_v49 }
  0xba   : > { %634 = vmatprep.subr.mxu0 %v398_v11  ;;  %4269 = vmatprep.subr.mxu1 %v4754_v20 }
  0xbb   : > { %v4800_v50 = vsub.f32 %v859_v45, %v4790_v47  ;;  %v807_v51 = vpop.trf.xlu0  ;;  %519 = vmatmul.mubr.f32.vlgmr.msra.gmra.mxu0 %v356_v28  ;;  %4172 = vmatmul.mubr.f32.vlgmr.msra.gmra.mxu1 %v4778_v39  ;;  %v1030_v53 = vsub.f32 %v4784_v43, %v6211_v46 }
  0xbc   : > { %v862_v52 = vsel %vm279_vm1, %v807_v51, 0  ;;  %4174 = vmatprep.mubr.f32.mxu1 %v4790_v47  ;;  %638 = vmatpush1.msra.mxu0 %v404_v10 }
  0xbd   : > { %v6210_v54 = vand.u32 4294901760, %v4800_v50  ;;  %v4811_v55 = vand.u32 4294901760, %v862_v52  ;;  %671 = vmatprep.mubr.f32.mxu0 %v4605_v2  ;;  %4119 = vmatprep.subr.mxu0 %v4754_v20  ;;  %v4815_v56 = vpop.trf.xlu1  ;;  %v1031_v62 = vand.u32 4294901760, %v1030_v53 }
  0xbe   : > { %4270 = vmatpush3.msra.mxu1 %v4754_v20 }
  0xbf   : > { %v4819_v58 = vsub.f32 %v862_v52, %v4811_v55  ;;  %v808_v59 = vpop.trf.xlu0  ;;  %673 = vmatmul.mubr.f32.vlgmr.msra.gmra.mxu0 %v355_v25  ;;  %4175 = vmatmul.mubr.f32.gmra.mxu1 %v4811_v55  ;;  %v1040_v60 = vsub.f32 %v4800_v50, %v6210_v54 }
  0xc0   : > { %v865_v61 = vsel %vm279_vm1, %v808_v59, 0  ;;  %4121 = vmatprep.mubr.f32.mxu0 %v1021_v57  ;;  %4120 = vmatpush3.msra.mxu0 %v4754_v20 }
  0xc1   : > { %v6209_v63 = vand.u32 4294901760, %v4819_v58  ;;  %v4828_v0 = vand.u32 4294901760, %v865_v61  ;;  %v1041_v1 = vand.u32 4294901760, %v1040_v60  ;;  %4219 = vmatprep.subr.mxu0 %v4757_v21  ;;  %4369 = vmatprep.subr.mxu1 %v4754_v20  ;;  %v4839_v5 = vpop.trf.xlu1 }
  0xc3   : > { %v4833_v2 = vsub.f32 %v865_v61, %v4828_v0  ;;  %v809_v3 = vpop.trf.xlu0  ;;  %4122 = vmatmul.mubr.f32.vlgmr.msra.gmra.mxu0 %v1031_v62  ;;  %4177 = vmatprep.mubr.f32.mxu1 %v4828_v0  ;;  %v1050_v4 = vsub.f32 %v4819_v58, %v6209_v63 }
  0xc4   : > { %v868_v6 = vsel %vm279_vm1, %v809_v3, 0  ;;  %4124 = vmatprep.mubr.f32.mxu0 %v1041_v1  ;;  %4220 = vmatpush3.msra.mxu0 %v4757_v21 }
  0xc5   : > { %v6208_v7 = vand.u32 4294901760, %v4833_v2  ;;  %v4844_v8 = vand.u32 4294901760, %v868_v6  ;;  %v1051_v9 = vand.u32 4294901760, %v1050_v4  ;;  %4319 = vmatprep.subr.mxu0 %v4760_v22  ;;  %v4858_v17 = vpop.trf.xlu1 }
  0xc7   : > { %v4848_v10 = vsub.f32 %v868_v6, %v4844_v8  ;;  %v810_v11 = vpop.trf.xlu0  ;;  %4125 = vmatmul.mubr.f32.gmra.mxu0 %v1051_v9  ;;  %4178 = vmatmul.mubr.f32.gmra.mxu1 %v4844_v8  ;;  %v1060_v12 = vsub.f32 %v4833_v2, %v6208_v7 }
  0xc8   : > { %v871_v13 = vsel %vm279_vm1, %v810_v11, 0 }
  0xc9   : > { %v6206_v14 = vand.u32 4294901760, %v4848_v10  ;;  %v4856_v15 = vand.u32 4294901760, %v871_v13  ;;  %v1061_v16 = vand.u32 4294901760, %v1060_v12  ;;  %v4878_v31 = vpop.trf.xlu1 }
  0xcb   : > { %v4861_v18 = vsub.f32 %v871_v13, %v4856_v15  ;;  %v811_v19 = vpop.trf.xlu0  ;;  %4127 = vmatprep.mubr.f32.mxu0 %v1061_v16  ;;  %4180 = vmatprep.mubr.f32.mxu1 %v4856_v15  ;;  %v1070_v21 = vsub.f32 %v4848_v10, %v6206_v14 }
  0xcc   : > { %v874_v23 = vsel %vm279_vm1, %v811_v19, 0 }
  0xcd   : > { %v6205_v24 = vand.u32 4294901760, %v4861_v18  ;;  %v4869_v25 = vand.u32 4294901760, %v874_v23  ;;  %v1071_v26 = vand.u32 4294901760, %v1070_v21  ;;  %v4895_v57 = vpop.trf.xlu1 }
  0xce   : > { %v925_v42 = vsel %vm279_vm1, %v4895_v57, 0 }
  0xcf   : > { %v4872_v28 = vsub.f32 %v874_v23, %v4869_v25  ;;  %v812_v29 = vpop.trf.xlu0  ;;  %4128 = vmatmul.mubr.f32.gmra.mxu0 %v1071_v26  ;;  %4181 = vmatmul.mubr.f32.gmra.mxu1 %v4869_v25  ;;  %v1080_v30 = vsub.f32 %v4861_v18, %v6205_v24 }
  0xd0   : > { %v877_v33 = vsel %vm279_vm1, %v812_v29, 0 }
  0xd1   : > { %v6204_v36 = vand.u32 4294901760, %v4872_v28  ;;  %v4882_v37 = vand.u32 4294901760, %v877_v33  ;;  %v1081_v38 = vand.u32 4294901760, %v1080_v30  ;;  %v4915_v12 = vpop.trf.xlu1 }
  0xd3   : > { %v4885_v40 = vsub.f32 %v877_v33, %v4882_v37  ;;  %v813_v44 = vpop.trf.xlu0  ;;  %4130 = vmatprep.mubr.f32.mxu0 %v1081_v38  ;;  %4183 = vmatprep.mubr.f32.mxu1 %v4882_v37  ;;  %v1090_v45 = vsub.f32 %v4872_v28, %v6204_v36 }
  0xd4   : > { %v880_v49 = vsel %vm279_vm1, %v813_v44, 0 }
  0xd5   : > { %v6203_v51 = vand.u32 4294901760, %v4885_v40  ;;  %v4893_v52 = vand.u32 4294901760, %v880_v49  ;;  %v1091_v53 = vand.u32 4294901760, %v1090_v45  ;;  %v4932_v45 = vpop.trf.xlu1 }
  0xd6   : > { %v931_v57 = vsel %vm279_vm1, %v4932_v45, 0 }
  0xd7   : > { %v4898_v59 = vsub.f32 %v880_v49, %v4893_v52  ;;  %v814_v60 = vpop.trf.xlu0  ;;  %4131 = vmatmul.mubr.f32.gmra.mxu0 %v1091_v53  ;;  %4184 = vmatmul.mubr.f32.gmra.mxu1 %v4893_v52  ;;  %v1100_v61 = vsub.f32 %v4885_v40, %v6203_v51  ;;  %v901_v49 = vsel %vm279_vm1, %v4765_v27, 0  ;;  %v916_v51 = vsel %vm279_vm1, %v4839_v5, 0 }
  0xd8   : > { %v883_v62 = vsel %vm279_vm1, %v814_v60, 0 }
  0xd9   : > { %v6202_v1 = vand.u32 4294901760, %v4898_v59  ;;  %v4906_v3 = vand.u32 4294901760, %v883_v62  ;;  %v1101_v4 = vand.u32 4294901760, %v1100_v61 }
  0xdb   : > { %v4909_v6 = vsub.f32 %v883_v62, %v4906_v3  ;;  %v815_v9 = vpop.trf.xlu0  ;;  %4133 = vmatprep.mubr.f32.mxu0 %v1101_v4  ;;  %4186 = vmatprep.mubr.f32.mxu1 %v4906_v3  ;;  %v1110_v11 = vsub.f32 %v4898_v59, %v6202_v1  ;;  %v904_v4 = vsel %vm279_vm1, %v4771_v34, 0 }
  0xdc   : > { %v886_v13 = vsel %vm279_vm1, %v815_v9, 0 }
  0xdd   : > { %v6200_v16 = vand.u32 4294901760, %v4909_v6  ;;  %v4919_v19 = vand.u32 4294901760, %v886_v13  ;;  %v1111_v21 = vand.u32 4294901760, %v1110_v11 }
  0xdf   : > { %v4922_v23 = vsub.f32 %v886_v13, %v4919_v19  ;;  %v816_v26 = vpop.trf.xlu0  ;;  %4134 = vmatmul.mubr.f32.gmra.mxu0 %v1111_v21  ;;  %4187 = vmatmul.mubr.f32.gmra.mxu1 %v4919_v19  ;;  %v1120_v29 = vsub.f32 %v4909_v6, %v6200_v16  ;;  %v4949_v13 = vand.u32 4294901760, %v901_v49  ;;  %v907_v21 = vsel %vm279_vm1, %v4780_v41, 0 }
  0xe0   : > { %v889_v30 = vsel %vm279_vm1, %v816_v26, 0  ;;  %v910_v41 = vsel %vm279_vm1, %v4793_v48, 0  ;;  %v4973_v16 = vand.u32 4294901760, %v907_v21 }
  0xe1   : > { %v6199_v33 = vand.u32 4294901760, %v4922_v23  ;;  %v4930_v38 = vand.u32 4294901760, %v889_v30  ;;  %v1121_v44 = vand.u32 4294901760, %v1120_v29  ;;  %6313 = vst [vmem:[#allocation11_spill] sm:$0xff] %v4949_v13 }
  0xe2   : > { %6316 = vst [vmem:[#allocation14_spill] sm:$0xff] %v4973_v16 }
  0xe3   : > { %6311 = vst [vmem:[#allocation9_spill] sm:$0xff] %v4930_v38  ;;  %v4937_v53 = vsub.f32 %v889_v30, %v4930_v38  ;;  %v817_v60 = vpop.trf.xlu0  ;;  %4136 = vmatprep.mubr.f32.mxu0 %v1121_v44  ;;  %4189 = vmatprep.mubr.f32.mxu1 %v4930_v38  ;;  %v1130_v61 = vsub.f32 %v4922_v23, %v6199_v33  ;;  %v4960_v30 = vpop.trf.xlu1  ;;  %v4962_v44 = vand.u32 4294901760, %v904_v4 }
  0xe4   : > { %v892_v62 = vsel %vm279_vm1, %v817_v60, 0  ;;  %v4971_v33 = vsub.f32 %v901_v49, %v4949_v13  ;;  %v4987_v49 = vand.u32 4294901760, %v910_v41 }
  0xe5   : > { %v6201_v9 = vand.u32 4294901760, %v4937_v53  ;;  %v4947_v11 = vand.u32 4294901760, %v892_v62  ;;  %v1131_v27 = vand.u32 4294901760, %v1130_v61  ;;  %6314 = vst [vmem:[#allocation12_spill] sm:$0xff] %v4962_v44 }
  0xe6   : > { %6317 = vst [vmem:[#allocation15_spill] sm:$0xff] %v4987_v49 }
  0xe7   : > { %6312 = vst [vmem:[#allocation10_spill] sm:$0xff] %v4947_v11  ;;  %v4954_v26 = vsub.f32 %v892_v62, %v4947_v11  ;;  %v818_v29 = vpop.trf.xlu0  ;;  %4137 = vmatmul.mubr.f32.gmra.mxu0 %v1131_v27  ;;  %4190 = vmatmul.mubr.f32.gmra.mxu1 %v4947_v11  ;;  %v1140_v34 = vsub.f32 %v4937_v53, %v6201_v9  ;;  %v913_v9 = vsel %vm279_vm1, %v4815_v56, 0  ;;  %v848_v14 = vpop.trf.xlu1 }
  0xe8   : > { %v895_v60 = vsel %vm279_vm1, %v818_v29, 0  ;;  %v5001_v7 = vand.u32 4294901760, %v913_v9 }
  0xe9   : > { %v6207_v61 = vand.u32 4294901760, %v4954_v26  ;;  %v4968_v62 = vand.u32 4294901760, %v895_v60  ;;  %v1141_v27 = vand.u32 4294901760, %v1140_v34  ;;  %v4985_v34 = vsub.f32 %v904_v4, %v4962_v44 }
  0xea   : > { %v4999_v4 = vsub.f32 %v907_v21, %v4973_v16  ;;  %6319 = vst [vmem:[#allocation17_spill] sm:$0xff] %v5001_v7  ;;  %v5017_v21 = vsub.f32 %v910_v41, %v4987_v49 }
  0xeb   : > { %6315 = vst [vmem:[#allocation13_spill] sm:$0xff] %v4968_v62  ;;  %v4978_v1 = vsub.f32 %v895_v60, %v4968_v62  ;;  %v819_v29 = vpop.trf.xlu0  ;;  %4139 = vmatprep.mubr.f32.mxu0 %v1141_v27  ;;  %4192 = vmatprep.mubr.f32.mxu1 %v4968_v62  ;;  %v1150_v48 = vsub.f32 %v4954_v26, %v6207_v61  ;;  %v919_v60 = vsel %vm279_vm1, %v4858_v17, 0  ;;  %v6214_v61 = vand.u32 4294901760, %v4971_v33  ;;  %v849_v41 = vpop.trf.xlu1 }
  0xec   : > { %v898_v56 = vsel %vm279_vm1, %v819_v29, 0  ;;  %v5013_v63 = vand.u32 4294901760, %v919_v60  ;;  %v6326_v45 = vand.u32 4294901760, %v5017_v21 }
  0xed   : > { %v6212_v27 = vand.u32 4294901760, %v4978_v1  ;;  %v4995_v36 = vand.u32 4294901760, %v898_v56  ;;  %v1151_v24 = vand.u32 4294901760, %v1150_v48  ;;  %v5011_v48 = vand.u32 4294901760, %v916_v51 }
  0xee   : > { %6321 = vst [vmem:[#allocation19_spill] sm:$0xff] %v5013_v63  ;;  %v1180_v29 = vsub.f32 %v4971_v33, %v6214_v61 }
  0xef   : > { %6318 = vst [vmem:[#allocation16_spill] sm:$0xff] %v4995_v36  ;;  %v5004_v5 = vsub.f32 %v898_v56, %v4995_v36  ;;  %4140 = vmatmul.mubr.f32.gmra.mxu0 %v1151_v24  ;;  %4193 = vmatmul.mubr.f32.gmra.mxu1 %v4995_v36  ;;  %v1160_v17 = vsub.f32 %v4978_v1, %v6212_v27  ;;  %6320 = vst [vmem:[#allocation18_spill] sm:$0xff] %v5011_v48  ;;  %v922_v24 = vsel %vm279_vm1, %v4878_v31, 0 }
  0xf0   : > { %4195 = vmatprep.mubr.f32.mxu1 %v4949_v13  ;;  %v5024_v27 = vsub.f32 %v913_v9, %v5001_v7  ;;  %v5039_v9 = vsub.f32 %v919_v60, %v5013_v63  ;;  %v5041_v46 = vand.u32 4294901760, %v922_v24  ;;  %v1181_v60 = vand.u32 4294901760, %v1180_v29 }
  0xf1   : > { %v6217_v56 = vand.u32 4294901760, %v5004_v5  ;;  %v1161_v54 = vand.u32 4294901760, %v1160_v17  ;;  %v5036_v17 = vsub.f32 %v916_v51, %v5011_v48  ;;  %v928_v51 = vsel %vm279_vm1, %v4915_v12, 0 }
  0xf2   : > { %v6324_v36 = vand.u32 4294901760, %v4999_v4  ;;  %v5062_v13 = vsub.f32 %v922_v24, %v5041_v46  ;;  %v934_v24 = vsel %vm279_vm1, %v4960_v30, 0  ;;  %v6330_v30 = vand.u32 4294901760, %v5039_v9 }
  0xf3   : > { %4142 = vmatprep.mubr.f32.mxu0 %v1161_v54  ;;  %4196 = vmatmul.mubr.f32.gmra.mxu1 %v4962_v44  ;;  %v1170_v31 = vsub.f32 %v5004_v5, %v6217_v56  ;;  %v5045_v54 = vand.u32 4294901760, %v925_v42  ;;  %v6323_v44 = vand.u32 4294901760, %v4985_v34 }
  0xf4   : > { %4198 = vmatprep.mubr.f32.mxu1 %v4973_v16  ;;  %v1200_v62 = vsub.f32 %v4999_v4, %v6324_v36  ;;  %v5068_v36 = vand.u32 4294901760, %v928_v51 }
  0xf5   : > { %6322 = vst [vmem:[#allocation20_spill] sm:$0xff] %v5045_v54  ;;  %v1171_v61 = vand.u32 4294901760, %v1170_v31  ;;  %v1190_v56 = vsub.f32 %v4985_v34, %v6323_v44  ;;  %v5066_v12 = vsub.f32 %v925_v42, %v5045_v54  ;;  %v5073_v31 = vand.u32 4294901760, %v931_v57 }
  0xf6   : > { %6325 = vst [vmem:[#allocation21_spill] sm:$0xff] %v5068_v36  ;;  %v1201_v44 = vand.u32 4294901760, %v1200_v62  ;;  %v937_v42 = vsel %vm279_vm1, %v848_v14, 0  ;;  %v1240_v62 = vsub.f32 %v5039_v9, %v6330_v30  ;;  %v5092_v14 = vsub.f32 %v928_v51, %v5068_v36 }
  0xf7   : > { %4143 = vmatmul.mubr.f32.gmra.mxu0 %v1171_v61  ;;  %4199 = vmatmul.mubr.f32.gmra.mxu1 %v4987_v49  ;;  %v1191_v29 = vand.u32 4294901760, %v1190_v56  ;;  %v1210_v61 = vsub.f32 %v5017_v21, %v6326_v45  ;;  %v850_v49 = vpop.trf.xlu1  ;;  %6327 = vst [vmem:[#allocation22_spill] sm:$0xff] %v5073_v31  ;;  %v6329_v45 = vand.u32 4294901760, %v5036_v17  ;;  %v5099_v56 = vand.u32 4294901760, %v937_v42 }
  0xf8   : > { %4145 = vmatprep.mubr.f32.mxu0 %v1181_v60  ;;  %4201 = vmatprep.mubr.f32.mxu1 %v5001_v7  ;;  %v6328_v60 = vand.u32 4294901760, %v5024_v27  ;;  %v943_v30 = vsel %vm279_vm1, %v850_v49, 0  ;;  %v1241_v11 = vand.u32 4294901760, %v1240_v62 }
  0xf9   : > { %v1230_v16 = vsub.f32 %v5036_v17, %v6329_v45  ;;  %v5121_v62 = vand.u32 4294901760, %v943_v30 }
  0xfa   : > { %v1220_v7 = vsub.f32 %v5024_v27, %v6328_v60 }
  0xfb   : > { %4146 = vmatmul.mubr.f32.gmra.mxu0 %v1191_v29  ;;  %4202 = vmatmul.mubr.f32.gmra.mxu1 %v5011_v48  ;;  %v5094_v29 = vand.u32 4294901760, %v934_v24  ;;  %v1211_v48 = vand.u32 4294901760, %v1210_v61  ;;  %v851_v60 = vpop.trf.xlu1  ;;  %v1231_v51 = vand.u32 4294901760, %v1230_v16  ;;  %v6331_v61 = vand.u32 4294901760, %v5062_v13 }
  0xfc   : > { %4148 = vmatprep.mubr.f32.mxu0 %v1201_v44  ;;  %4204 = vmatprep.mubr.f32.mxu1 %v5013_v63  ;;  %v5097_v44 = vsub.f32 %v931_v57, %v5073_v31  ;;  %v940_v63 = vsel %vm279_vm1, %v849_v41, 0  ;;  %v1221_v45 = vand.u32 4294901760, %v1220_v7  ;;  %v5119_v16 = vsub.f32 %v937_v42, %v5099_v56 }
  0xfd   : > { %v1250_v57 = vsub.f32 %v5062_v13, %v6331_v61  ;;  %v5110_v41 = vsub.f32 %v934_v24, %v5094_v29  ;;  %v5112_v7 = vand.u32 4294901760, %v940_v63  ;;  %v946_v61 = vsel %vm279_vm1, %v851_v60, 0 }
  0xfe   : > { %v6333_v42 = vand.u32 4294901760, %v5092_v14 }
  0xff   : > { %4149 = vmatmul.mubr.f32.gmra.mxu0 %v1211_v48  ;;  %4205 = vmatmul.mubr.f32.gmra.mxu1 %v5041_v46  ;;  %v6332_v48 = vand.u32 4294901760, %v5066_v12  ;;  %v1251_v24 = vand.u32 4294901760, %v1250_v57  ;;  %v6244_v38 = vand.u32 4294901760, %v5110_v41 }
 0x100   : > { %4151 = vmatprep.mubr.f32.mxu0 %v1221_v45  ;;  %4207 = vmatprep.mubr.f32.mxu1 %v5045_v54  ;;  %v5130_v45 = vand.u32 4294901760, %v946_v61  ;;  %v1270_v54 = vsub.f32 %v5092_v14, %v6333_v42 }
 0x101   : > { %v1260_v49 = vsub.f32 %v5066_v12, %v6332_v48  ;;  %v5128_v48 = vsub.f32 %v940_v63, %v5112_v7 }
 0x102   : > { %v5146_v42 = vsub.f32 %v946_v61, %v5130_v45  ;;  %v1271_v60 = vand.u32 4294901760, %v1270_v54 }
 0x103   : > { %4152 = vmatmul.mubr.f32.gmra.mxu0 %v1231_v51  ;;  %4208 = vmatmul.mubr.f32.gmra.mxu1 %v5068_v36  ;;  %v5137_v51 = vsub.f32 %v943_v30, %v5121_v62  ;;  %v1309_v63 = vand.u32 4294901760, %v5128_v48  ;;  %v1290_v30 = vsub.f32 %v5110_v41, %v6244_v38 }
 0x104   : > { %4154 = vmatprep.mubr.f32.mxu0 %v1241_v11  ;;  %4210 = vmatprep.mubr.f32.mxu1 %v5073_v31  ;;  %v1261_v11 = vand.u32 4294901760, %v1260_v49  ;;  %v6334_v31 = vand.u32 4294901760, %v5097_v44  ;;  %v1329_v61 = vand.u32 4294901760, %v5146_v42 }
 0x105   : > { %v6245_v49 = vand.u32 4294901760, %v5137_v51  ;;  %v1291_v54 = vand.u32 4294901760, %v1290_v30 }
 0x106   : > { %v1280_v57 = vsub.f32 %v5097_v44, %v6334_v31  ;;  %v6335_v31 = vand.u32 4294901760, %v5119_v16  ;;  %v1330_v30 = vsub.f32 %v5146_v42, %v1329_v61 }
 0x107   : > { %4155 = vmatmul.mubr.f32.gmra.mxu0 %v1251_v24  ;;  %4211 = vmatmul.mubr.f32.gmra.mxu1 %v5094_v29 }
 0x108   : > { %4157 = vmatprep.mubr.f32.mxu0 %v1261_v11  ;;  %4213 = vmatprep.mubr.f32.mxu1 %v5099_v56  ;;  %v1281_v36 = vand.u32 4294901760, %v1280_v57  ;;  %v1300_v24 = vsub.f32 %v5119_v16, %v6335_v31  ;;  %v1310_v11 = vsub.f32 %v5128_v48, %v1309_v63  ;;  %v1320_v57 = vsub.f32 %v5137_v51, %v6245_v49 }
 0x109   : > { %v6338_v49 = vand.u32 4294901760, %v4800_v50 }
 0x10a   : > { %v1301_v38 = vand.u32 4294901760, %v1300_v24  ;;  %v1321_v31 = vand.u32 4294901760, %v1320_v57  ;;  %v6337_v24 = vand.u32 4294901760, %v4784_v43  ;;  %v6341_v57 = vand.u32 4294901760, %v4848_v10 }
 0x10b   : > { %4158 = vmatmul.mubr.f32.gmra.mxu0 %v1271_v60  ;;  %4214 = vmatmul.mubr.f32.gmra.mxu1 %v5112_v7  ;;  %v1311_v60 = vand.u32 4294901760, %v1310_v11  ;;  %v6340_v11 = vand.u32 4294901760, %v4833_v2 }
 0x10c   : > { %4160 = vmatprep.mubr.f32.mxu0 %v1281_v36  ;;  %4216 = vmatprep.mubr.f32.mxu1 %v5121_v62  ;;  %v6336_v36 = vand.u32 4294901760, %v4774_v35 }
 0x10f   : > { %4161 = vmatmul.mubr.f32.gmra.mxu0 %v1291_v54  ;;  %4217 = vmatmul.mubr.f32.gmra.mxu1 %v5130_v45  ;;  %v1331_v54 = vand.u32 4294901760, %v1330_v30 }
 0x110   : > { %4163 = vmatprep.mubr.f32.mxu0 %v1301_v38  ;;  %4271 = vmatprep.mubr.f32.mxu1 %v6336_v36  ;;  %v6339_v38 = vand.u32 4294901760, %v4819_v58 }
 0x113   : > { %4164 = vmatmul.mubr.f32.gmra.mxu0 %v1311_v60  ;;  %4272 = vmatmul.mubr.f32.vlgmr.msra.gmra.mxu1 %v6337_v24 }
 0x114   : > { %4166 = vmatprep.mubr.f32.mxu0 %v1321_v31  ;;  %4274 = vmatprep.mubr.f32.mxu1 %v6338_v49  ;;  %v6342_v49 = vand.u32 4294901760, %v4861_v18 }
 0x115   : > { %4370 = vmatpush3.msra.mxu1 %v4754_v20  ;;  %v6343_v20 = vand.u32 4294901760, %v4872_v28 }
 0x117   : > { %4167 = vmatmul.mubr.f32.gmra.mxu0 %v1331_v54  ;;  %4275 = vmatmul.mubr.f32.gmra.mxu1 %v6339_v38 }
 0x118   : > { %4221 = vmatprep.mubr.f32.mxu0 %v4774_v35  ;;  %4277 = vmatprep.mubr.f32.mxu1 %v6340_v11  ;;  %v6344_v35 = vand.u32 4294901760, %v4885_v40  ;;  %v6377_v11 = vld [vmem:[#allocation20_spill] sm:$0xff] }
 0x11b   : > { %4222 = vmatmul.mubr.f32.vlgmr.msra.gmra.mxu0 %v4784_v43  ;;  %4278 = vmatmul.mubr.f32.gmra.mxu1 %v6341_v57  ;;  %v6345_v43 = vand.u32 4294901760, %v4898_v59 }
 0x11c   : > { %4224 = vmatprep.mubr.f32.mxu0 %v4800_v50  ;;  %4280 = vmatprep.mubr.f32.mxu1 %v6342_v49  ;;  %v6346_v50 = vand.u32 4294901760, %v4909_v6 }
 0x11d   : > { %4320 = vmatpush3.msra.mxu0 %v4760_v22  ;;  %v6347_v22 = vand.u32 4294901760, %v4922_v23 }
 0x11f   : > { %4225 = vmatmul.mubr.f32.gmra.mxu0 %v4819_v58  ;;  %4281 = vmatmul.mubr.f32.gmra.mxu1 %v6343_v20  ;;  %v6348_v58 = vand.u32 4294901760, %v4937_v53 }
 0x120   : > { %4227 = vmatprep.mubr.f32.mxu0 %v4833_v2  ;;  %4283 = vmatprep.mubr.f32.mxu1 %v6344_v35  ;;  %v6349_v2 = vand.u32 4294901760, %v4954_v26 }
 0x123   : > { %4228 = vmatmul.mubr.f32.gmra.mxu0 %v4848_v10  ;;  %4284 = vmatmul.mubr.f32.gmra.mxu1 %v6345_v43  ;;  %v6350_v10 = vand.u32 4294901760, %v4978_v1 }
 0x124   : > { %4230 = vmatprep.mubr.f32.mxu0 %v4861_v18  ;;  %4286 = vmatprep.mubr.f32.mxu1 %v6346_v50  ;;  %v6351_v18 = vand.u32 4294901760, %v5004_v5 }
 0x127   : > { %4231 = vmatmul.mubr.f32.gmra.mxu0 %v4872_v28  ;;  %4287 = vmatmul.mubr.f32.gmra.mxu1 %v6347_v22  ;;  %v6352_v28 = vand.u32 4294901760, %v4971_v33  ;;  %v6378_v22 = vld [vmem:[#allocation21_spill] sm:$0xff] }
 0x128   : > { %4233 = vmatprep.mubr.f32.mxu0 %v4885_v40  ;;  %4289 = vmatprep.mubr.f32.mxu1 %v6348_v58  ;;  %v6353_v40 = vand.u32 4294901760, %v4985_v34 }
 0x12b   : > { %4234 = vmatmul.mubr.f32.gmra.mxu0 %v4898_v59  ;;  %4290 = vmatmul.mubr.f32.gmra.mxu1 %v6349_v2  ;;  %v6354_v59 = vand.u32 4294901760, %v4999_v4 }
 0x12c   : > { %4236 = vmatprep.mubr.f32.mxu0 %v4909_v6  ;;  %4292 = vmatprep.mubr.f32.mxu1 %v6350_v10  ;;  %v6355_v6 = vand.u32 4294901760, %v5017_v21  ;;  %v6379_v10 = vld [vmem:[#allocation22_spill] sm:$0xff] }
 0x12f   : > { %4237 = vmatmul.mubr.f32.gmra.mxu0 %v4922_v23  ;;  %4293 = vmatmul.mubr.f32.gmra.mxu1 %v6351_v18  ;;  %v6356_v23 = vand.u32 4294901760, %v5024_v27 }
 0x130   : > { %4239 = vmatprep.mubr.f32.mxu0 %v4937_v53  ;;  %4295 = vmatprep.mubr.f32.mxu1 %v6352_v28  ;;  %v6357_v53 = vand.u32 4294901760, %v5036_v17 }
 0x133   : > { %4240 = vmatmul.mubr.f32.gmra.mxu0 %v4954_v26  ;;  %4296 = vmatmul.mubr.f32.gmra.mxu1 %v6353_v40  ;;  %v6359_v26 = vand.u32 4294901760, %v5062_v13 }
 0x134   : > { %4242 = vmatprep.mubr.f32.mxu0 %v4978_v1  ;;  %4298 = vmatprep.mubr.f32.mxu1 %v6354_v59  ;;  %v6358_v1 = vand.u32 4294901760, %v5039_v9 }
 0x137   : > { %4243 = vmatmul.mubr.f32.gmra.mxu0 %v5004_v5  ;;  %4299 = vmatmul.mubr.f32.gmra.mxu1 %v6355_v6  ;;  %v6363_v5 = vand.u32 4294901760, %v5110_v41 }
 0x138   : > { %4245 = vmatprep.mubr.f32.mxu0 %v4971_v33  ;;  %4301 = vmatprep.mubr.f32.mxu1 %v6356_v23  ;;  %v6360_v33 = vand.u32 4294901760, %v5066_v12 }
 0x13b   : > { %4246 = vmatmul.mubr.f32.gmra.mxu0 %v4985_v34  ;;  %4302 = vmatmul.mubr.f32.gmra.mxu1 %v6357_v53  ;;  %v6361_v34 = vand.u32 4294901760, %v5092_v14 }
 0x13c   : > { %4248 = vmatprep.mubr.f32.mxu0 %v4999_v4  ;;  %4304 = vmatprep.mubr.f32.mxu1 %v6358_v1  ;;  %v6362_v4 = vand.u32 4294901760, %v5097_v44 }
 0x13f   : > { %4249 = vmatmul.mubr.f32.gmra.mxu0 %v5017_v21  ;;  %4305 = vmatmul.mubr.f32.gmra.mxu1 %v6359_v26  ;;  %v6365_v21 = vand.u32 4294901760, %v5137_v51 }
 0x140   : > { %4251 = vmatprep.mubr.f32.mxu0 %v5024_v27  ;;  %4307 = vmatprep.mubr.f32.mxu1 %v6360_v33  ;;  %v6364_v27 = vand.u32 4294901760, %v5119_v16 }
 0x143   : > { %4252 = vmatmul.mubr.f32.gmra.mxu0 %v5036_v17  ;;  %4308 = vmatmul.mubr.f32.gmra.mxu1 %v6361_v34 }
 0x144   : > { %4254 = vmatprep.mubr.f32.mxu0 %v5039_v9  ;;  %4310 = vmatprep.mubr.f32.mxu1 %v6362_v4  ;;  %v6373_v9 = vld [vmem:[#allocation15_spill] sm:$0xff] }
 0x147   : > { %4255 = vmatmul.mubr.f32.gmra.mxu0 %v5062_v13  ;;  %4311 = vmatmul.mubr.f32.gmra.mxu1 %v6363_v5  ;;  %v243_v13 = vpop.permute.xlu1 %242 }
 0x148   : > { %4257 = vmatprep.mubr.f32.mxu0 %v5066_v12  ;;  %4313 = vmatprep.mubr.f32.mxu1 %v6364_v27 }
 0x14b   : > { %4258 = vmatmul.mubr.f32.gmra.mxu0 %v5092_v14  ;;  %4314 = vmatmul.mubr.f32.gmra.mxu1 %v1309_v63  ;;  %v6374_v14 = vld [vmem:[#allocation17_spill] sm:$0xff]  ;;  %v6375_v63 = vld [vmem:[#allocation18_spill] sm:$0xff] }
 0x14c   : > { %4260 = vmatprep.mubr.f32.mxu0 %v5097_v44  ;;  %4316 = vmatprep.mubr.f32.mxu1 %v6365_v21 }
 0x14f   : > { %4261 = vmatmul.mubr.f32.gmra.mxu0 %v5110_v41  ;;  %4317 = vmatmul.mubr.f32.gmra.mxu1 %v1329_v61  ;;  %v6376_v61 = vld [vmem:[#allocation19_spill] sm:$0xff] }
 0x150   : > { %4263 = vmatprep.mubr.f32.mxu0 %v5119_v16  ;;  %4371 = vmatprep.mubr.f32.mxu1 %v4769_v32 }
 0x153   : > { %4264 = vmatmul.mubr.f32.gmra.mxu0 %v5128_v48  ;;  %4372 = vmatmul.mubr.f32.vlgmr.msra.gmra.mxu1 %v4778_v39 }
 0x154   : > { %4266 = vmatprep.mubr.f32.mxu0 %v5137_v51  ;;  %4374 = vmatprep.mubr.f32.mxu1 %v4790_v47 }
 0x157   : > { %4267 = vmatmul.mubr.f32.gmra.mxu0 %v5146_v42  ;;  %4375 = vmatmul.mubr.f32.gmra.mxu1 %v4811_v55 }
 0x158   : > { %4321 = vmatprep.mubr.f32.mxu0 %v4769_v32  ;;  %4377 = vmatprep.mubr.f32.mxu1 %v4828_v0  ;;  %v6366_v32 = vld [vmem:[#allocation9_spill] sm:$0xff] }
 0x15b   : > { %4322 = vmatmul.mubr.f32.vlgmr.msra.gmra.mxu0 %v4778_v39  ;;  %4378 = vmatmul.mubr.f32.gmra.mxu1 %v4844_v8  ;;  %v6367_v39 = vld [vmem:[#allocation10_spill] sm:$0xff] }
 0x15c   : > { %4324 = vmatprep.mubr.f32.mxu0 %v4790_v47  ;;  %4380 = vmatprep.mubr.f32.mxu1 %v4856_v15  ;;  %v6368_v47 = vld [vmem:[#allocation13_spill] sm:$0xff] }
 0x15f   : > { %4325 = vmatmul.mubr.f32.gmra.mxu0 %v4811_v55  ;;  %4381 = vmatmul.mubr.f32.gmra.mxu1 %v4869_v25 }
 0x160   : > { %4327 = vmatprep.mubr.f32.mxu0 %v4828_v0  ;;  %4383 = vmatprep.mubr.f32.mxu1 %v4882_v37  ;;  %v6369_v0 = vld [vmem:[#allocation16_spill] sm:$0xff] }
 0x163   : > { %4328 = vmatmul.mubr.f32.gmra.mxu0 %v4844_v8  ;;  %4384 = vmatmul.mubr.f32.gmra.mxu1 %v4893_v52  ;;  %v6370_v8 = vld [vmem:[#allocation11_spill] sm:$0xff] }
 0x164   : > { %4330 = vmatprep.mubr.f32.mxu0 %v4856_v15  ;;  %4386 = vmatprep.mubr.f32.mxu1 %v4906_v3 }
 0x167   : > { %4331 = vmatmul.mubr.f32.gmra.mxu0 %v4869_v25  ;;  %4387 = vmatmul.mubr.f32.gmra.mxu1 %v4919_v19 }
 0x168   : > { %4333 = vmatprep.mubr.f32.mxu0 %v4882_v37  ;;  %4389 = vmatprep.mubr.f32.mxu1 %v6366_v32  ;;  %v6371_v37 = vld [vmem:[#allocation12_spill] sm:$0xff] }
 0x16b   : > { %4334 = vmatmul.mubr.f32.gmra.mxu0 %v4893_v52  ;;  %4390 = vmatmul.mubr.f32.gmra.mxu1 %v6367_v39  ;;  %v6372_v52 = vld [vmem:[#allocation14_spill] sm:$0xff] }
 0x16c   : > { %4336 = vmatprep.mubr.f32.mxu0 %v4906_v3  ;;  %4392 = vmatprep.mubr.f32.mxu1 %v6368_v47 }
 0x16f   : > { %v443_v55 = vpop.f32.mrf.mxu1  ;;  %4337 = vmatmul.mubr.f32.gmra.mxu0 %v4919_v19  ;;  %4393 = vmatmul.mubr.f32.gmra.mxu1 %v6369_v0 }
 0x170   : > { %4339 = vmatprep.mubr.f32.mxu0 %v6366_v32  ;;  %4395 = vmatprep.mubr.f32.mxu1 %v6370_v8 }
 0x171   : > { %v445_v15 = vpop.f32.mrf.mxu1 }
 0x173   : > { %v596_v25 = vpop.f32.mrf.mxu1  ;;  %4340 = vmatmul.mubr.f32.gmra.mxu0 %v6367_v39  ;;  %4396 = vmatmul.mubr.f32.gmra.mxu1 %v6371_v37 }
 0x174   : > { %4342 = vmatprep.mubr.f32.mxu0 %v6368_v47  ;;  %4398 = vmatprep.mubr.f32.mxu1 %v6372_v52 }
 0x175   : > { %v598_v3 = vpop.f32.mrf.mxu1 }
 0x177   : > { %v361_v17 = vpop.f32.mrf.mxu0  ;;  %v748_v19 = vpop.f32.mrf.mxu1  ;;  %4343 = vmatmul.mubr.f32.gmra.mxu0 %v6369_v0  ;;  %4399 = vmatmul.mubr.f32.gmra.mxu1 %v6373_v9 }
 0x178   : > { %v362_v12 = vadd.f32 %v361_v17, %v243_v13  ;;  %4345 = vmatprep.mubr.f32.mxu0 %v6370_v8  ;;  %4401 = vmatprep.mubr.f32.mxu1 %v6374_v14 }
 0x179   : > { %v363_v44 = vpop.f32.mrf.mxu0  ;;  %v750_v41 = vpop.f32.mrf.mxu1 }
 0x17a   : > { %v364_v16 = vadd.f32 %v363_v44, %v243_v13  ;;  %v444_v48 = vadd.f32 %v443_v55, %v362_v12 }
 0x17b   : > { %v520_v51 = vpop.f32.mrf.mxu0  ;;  %4346 = vmatmul.mubr.f32.gmra.mxu0 %v6371_v37  ;;  %4402 = vmatmul.mubr.f32.gmra.mxu1 %v6375_v63  ;;  %v4173_v60 = vpop.f32.mrf.mxu1 }
 0x17c   : > { %v521_v42 = vadd.f32 %v520_v51, %v444_v48  ;;  %4348 = vmatprep.mubr.f32.mxu0 %v6372_v52  ;;  %4404 = vmatprep.mubr.f32.mxu1 %v6376_v61  ;;  %v446_v36 = vadd.f32 %v445_v15, %v364_v16 }
 0x17d   : > { %v522_v30 = vpop.f32.mrf.mxu0  ;;  %v1409_v49 = vpop.f32.mrf.mxu1 }
 0x17e   : > { %v523_v31 = vadd.f32 %v522_v30, %v446_v36  ;;  %v597_v24 = vadd.f32 %v596_v25, %v521_v42 }
 0x17f   : > { %v674_v54 = vpop.f32.mrf.mxu0  ;;  %4349 = vmatmul.mubr.f32.gmra.mxu0 %v6373_v9  ;;  %4405 = vmatmul.mubr.f32.gmra.mxu1 %v5041_v46  ;;  %v4176_v18 = vpop.f32.mrf.mxu1 }
 0x180   : > { %v675_v38 = vadd.f32 %v674_v54, %v597_v24  ;;  %4351 = vmatprep.mubr.f32.mxu0 %v6374_v14  ;;  %4407 = vmatprep.mubr.f32.mxu1 %v6377_v11  ;;  %v599_v57 = vadd.f32 %v598_v3, %v523_v31 }
 0x181   : > { %v676_v20 = vpop.f32.mrf.mxu0  ;;  %v1421_v1 = vpop.f32.mrf.mxu1 }
 0x182   : > { %v5312_v35 = vadd.f32 %v748_v19, %v675_v38  ;;  %v677_v43 = vadd.f32 %v676_v20, %v599_v57 }
 0x183   : > { %v4123_v50 = vpop.f32.mrf.mxu0  ;;  %4352 = vmatmul.mubr.f32.gmra.mxu0 %v6375_v63  ;;  %4408 = vmatmul.mubr.f32.gmra.mxu1 %v6378_v22 }
 0x184   : > { %v751_v58 = vadd.f32 %v750_v41, %v677_v43  ;;  %v5316_v2 = vadd.f32 %v4173_v60, %v4123_v50  ;;  %4354 = vmatprep.mubr.f32.mxu0 %v6376_v61  ;;  %4410 = vmatprep.mubr.f32.mxu1 %v6379_v10 }
 0x185   : > { %v1023_v28 = vpop.f32.mrf.mxu0 }
 0x186   : > { %v759_v40 = vrot.slane %v751_v58, 4  ;;  %v5320_v59 = vadd.f32 %v1409_v49, %v1023_v28 }
 0x187   : > { %v4126_v6 = vpop.f32.mrf.mxu0  ;;  %4355 = vmatmul.mubr.f32.gmra.mxu0 %v5041_v46  ;;  %4411 = vmatmul.mubr.f32.gmra.mxu1 %v5094_v29  ;;  %v4179_v46 = vpop.f32.mrf.mxu1 }
 0x188   : > { %v760_v23 = vmax.f32 %v751_v58, %v759_v40  ;;  %v5324_v53 = vadd.f32 %v4176_v18, %v4126_v6  ;;  %4357 = vmatprep.mubr.f32.mxu0 %v6377_v11  ;;  %4413 = vmatprep.mubr.f32.mxu1 %v5099_v56 }
 0x189   : > { %v1043_v26 = vpop.f32.mrf.mxu0  ;;  %v1433_v39 = vpop.f32.mrf.mxu1 }
 0x18a   : > { %v761_v33 = vrot.slane %v760_v23, 2  ;;  %v5328_v34 = vadd.f32 %v1421_v1, %v1043_v26 }
 0x18b   : > { %4358 = vmatmul.mubr.f32.gmra.mxu0 %v6378_v22  ;;  %4414 = vmatmul.mubr.f32.gmra.mxu1 %v5112_v7 }
 0x18c   : > { %v762_v4 = vmax.f32 %v760_v23, %v761_v33  ;;  %4360 = vmatprep.mubr.f32.mxu0 %v6379_v10  ;;  %4416 = vmatprep.mubr.f32.mxu1 %v5121_v62 }
 0x18e   : > { %v763_v5 = vrot.slane %v762_v4, 1 }
 0x18f   : > { %v4129_v27 = vpop.f32.mrf.mxu0  ;;  %4361 = vmatmul.mubr.f32.gmra.mxu0 %v5094_v29  ;;  %4417 = vmatmul.mubr.f32.gmra.mxu1 %v5130_v45  ;;  %v4182_v15 = vpop.f32.mrf.mxu1 }
 0x190   : > { %v764_v21 = vmax.f32 %v762_v4, %v763_v5  ;;  %v5336_v32 = vadd.f32 %v4179_v46, %v4129_v27  ;;  %4363 = vmatprep.mubr.f32.mxu0 %v5099_v56 }
 0x191   : > { %v1063_v47 = vpop.f32.mrf.mxu0  ;;  %v1445_v37 = vpop.f32.mrf.mxu1 }
 0x192   : > { %v766_v55 = vsub.f32 %v751_v58, %v764_v21  ;;  %v5339_v0 = vadd.f32 %v1433_v39, %v1063_v47 }
 0x193   : > { %4364 = vmatmul.mubr.f32.gmra.mxu0 %v5112_v7 }
 0x194   : > { %v769_v8 = vmul.f32 1.442695, %v766_v55  ;;  %4366 = vmatprep.mubr.f32.mxu0 %v5121_v62 }
 0x196   : > { %4486 = vpow2.f32 %v769_v8 }
 0x197   : > { %v4132_v29 = vpop.f32.mrf.mxu0  ;;  %4367 = vmatmul.mubr.f32.gmra.mxu0 %v5130_v45  ;;  %v4185_v3 = vpop.f32.mrf.mxu1 }
 0x198   : > { %v5344_v25 = vadd.f32 %v4182_v15, %v4132_v29 }
 0x199   : > { %v1083_v52 = vpop.f32.mrf.mxu0  ;;  %v1457_v19 = vpop.f32.mrf.mxu1 }
 0x19a   : > { %v5346_v56 = vadd.f32 %v1445_v37, %v1083_v52 }
 0x19f   : > { %v4135_v13 = vpop.f32.mrf.mxu0  ;;  %v4188_v12 = vpop.f32.mrf.mxu1 }
 0x1a0   : > { %v5348_v17 = vadd.f32 %v4185_v3, %v4135_v13 }
 0x1a1   : > { %v1103_v7 = vpop.f32.mrf.mxu0  ;;  %v1469_v41 = vpop.f32.mrf.mxu1 }
 0x1a2   : > { %v5350_v9 = vadd.f32 %v1457_v19, %v1103_v7 }
 0x1a3   : > { %v4487_v62 = vpop.eup %4486 }
 0x1a4   : > { %v777_v14 = vrot.slane %v4487_v62, 4 }
 0x1a6   : > { %v778_v44 = vadd.f32 %v4487_v62, %v777_v14 }
 0x1a7   : > { %v4138_v45 = vpop.f32.mrf.mxu0  ;;  %v4191_v51 = vpop.f32.mrf.mxu1 }
 0x1a8   : > { %v5352_v16 = vadd.f32 %v4188_v12, %v4138_v45  ;;  %v779_v48 = vrot.slane %v778_v44, 2 }
 0x1a9   : > { %v1123_v63 = vpop.f32.mrf.mxu0  ;;  %v1481_v60 = vpop.f32.mrf.mxu1 }
 0x1aa   : > { %v5354_v42 = vadd.f32 %v1469_v41, %v1123_v63  ;;  %v780_v61 = vadd.f32 %v779_v48, %v778_v44 }
 0x1ac   : > { %v781_v36 = vrot.slane %v780_v61, 1 }
 0x1ae   : > { %v782_v30 = vadd.f32 %v781_v36, %v780_v61 }
 0x1af   : > { %v4141_v31 = vpop.f32.mrf.mxu0  ;;  %v4194_v24 = vpop.f32.mrf.mxu1 }
 0x1b0   : > { %v5356_v54 = vadd.f32 %v4191_v51, %v4141_v31  ;;  %4488 = vrcp.f32 %v782_v30 }
 0x1b1   : > { %v1143_v38 = vpop.f32.mrf.mxu0  ;;  %v1493_v11 = vpop.f32.mrf.mxu1 }
 0x1b2   : > { %v5358_v57 = vadd.f32 %v1481_v60, %v1143_v38 }
 0x1b3   : > { %v4197_v49 = vpop.f32.mrf.mxu1 }
 0x1b5   : > { %v1505_v20 = vpop.f32.mrf.mxu1 }
 0x1b7   : > { %v4144_v43 = vpop.f32.mrf.mxu0  ;;  %v4200_v50 = vpop.f32.mrf.mxu1 }
 0x1b8   : > { %v5360_v22 = vadd.f32 %v4194_v24, %v4144_v43 }
 0x1b9   : > { %v1163_v58 = vpop.f32.mrf.mxu0  ;;  %v1517_v10 = vpop.f32.mrf.mxu1 }
 0x1ba   : > { %v5362_v18 = vadd.f32 %v1493_v11, %v1163_v58 }
 0x1bb   : > { %v4147_v28 = vpop.f32.mrf.mxu0  ;;  %v4203_v40 = vpop.f32.mrf.mxu1 }
 0x1bc   : > { %v5364_v6 = vadd.f32 %v4197_v49, %v4147_v28 }
 0x1bd   : > { %v4489_v23 = vpop.eup %4488  ;;  %v1183_v1 = vpop.f32.mrf.mxu0 }
 0x1be   : > { %v1529_v26 = vpop.f32.mrf.mxu1  ;;  %v5366_v33 = vadd.f32 %v1505_v20, %v1183_v1  ;;  %v786_v4 = vmul.f32 %v4489_v23, %v4487_v62 }
 0x1bf   : > { %v4150_v46 = vpop.f32.mrf.mxu0 }
 0x1c0   : > { %v4206_v5 = vpop.f32.mrf.mxu1  ;;  %v5368_v27 = vadd.f32 %v4200_v50, %v4150_v46  ;;  %v5370_v21 = vand.u32 4294901760, %v786_v4 }
 0x1c1   : > { %v1203_v39 = vpop.f32.mrf.mxu0 }
 0x1c2   : > { %6380 = vst [vmem:[#allocation9_spill] sm:$0xff] %v5370_v21  ;;  %v1541_v47 = vpop.f32.mrf.mxu1  ;;  %v5372_v55 = vadd.f32 %v1517_v10, %v1203_v39  ;;  %3068 = vmatprep.mubr.f32.mxu1 %v5370_v21  ;;  %v5376_v8 = vsub.f32 %v786_v4, %v5370_v21 }
 0x1c3   : > { %v4153_v15 = vpop.f32.mrf.mxu0 }
 0x1c4   : > { %6381 = vst [vmem:[#allocation10_spill] sm:$0xff] %v5376_v8  ;;  %v4209_v29 = vpop.f32.mrf.mxu1  ;;  %v5378_v37 = vadd.f32 %v4203_v40, %v4153_v15  ;;  %v6246_v52 = vand.u32 4294901760, %v5376_v8 }
 0x1c5   : > { %v1223_v3 = vpop.f32.mrf.mxu0 }
 0x1c6   : > { %v1553_v13 = vpop.f32.mrf.mxu1  ;;  %v5381_v19 = vadd.f32 %v1529_v26, %v1223_v3  ;;  %v2830_v7 = vsub.f32 %v5376_v8, %v6246_v52 }
 0x1c7   : > { %v4156_v62 = vpop.f32.mrf.mxu0 }
 0x1c8   : > { %v4212_v12 = vpop.f32.mrf.mxu1  ;;  %v5386_v14 = vadd.f32 %v4206_v5, %v4156_v62  ;;  %v2831_v44 = vand.u32 4294901760, %v2830_v7 }
 0x1c9   : > { %v1243_v41 = vpop.f32.mrf.mxu0 }
 0x1ca   : > { %v1565_v45 = vpop.f32.mrf.mxu1  ;;  %v5388_v48 = vadd.f32 %v1541_v47, %v1243_v41  ;;  %2832 = vmatprep.mubr.f32.mxu0 %v2831_v44 }
 0x1cb   : > { %v4159_v51 = vpop.f32.mrf.mxu0 }
 0x1cc   : > { %v4215_v63 = vpop.f32.mrf.mxu1  ;;  %v5390_v61 = vadd.f32 %v4209_v29, %v4159_v51 }
 0x1cd   : > { %v1263_v36 = vpop.f32.mrf.mxu0 }
 0x1ce   : > { %v1577_v60 = vpop.f32.mrf.mxu1  ;;  %v5392_v30 = vadd.f32 %v1553_v13, %v1263_v36 }
 0x1cf   : > { %v4162_v31 = vpop.f32.mrf.mxu0 }
 0x1d0   : > { %v4218_v24 = vpop.f32.mrf.mxu1  ;;  %v5394_v38 = vadd.f32 %v4212_v12, %v4162_v31 }
 0x1d1   : > { %v1283_v11 = vpop.f32.mrf.mxu0 }
 0x1d2   : > { %v1589_v49 = vpop.f32.mrf.mxu1  ;;  %v5396_v20 = vadd.f32 %v1565_v45, %v1283_v11 }
 0x1d3   : > { %v4165_v43 = vpop.f32.mrf.mxu0 }
 0x1d4   : > { %v4273_v50 = vpop.f32.mrf.mxu1  ;;  %v5398_v58 = vadd.f32 %v4215_v63, %v4165_v43 }
 0x1d5   : > { %v1303_v10 = vpop.f32.mrf.mxu0 }
 0x1d6   : > { %v1960_v28 = vpop.f32.mrf.mxu1  ;;  %v5400_v40 = vadd.f32 %v1577_v60, %v1303_v10  ;;  %v753_v10 = vrot.slane %v5312_v35, 4 }
 0x1d7   : > { %v4168_v23 = vpop.f32.mrf.mxu0 }
 0x1d8   : > { %v4276_v1 = vpop.f32.mrf.mxu1  ;;  %v5402_v26 = vadd.f32 %v4218_v24, %v4168_v23 }
 0x1d9   : > { %v1323_v4 = vpop.f32.mrf.mxu0 }
 0x1da   : > { %v1976_v46 = vpop.f32.mrf.mxu1  ;;  %v5404_v5 = vadd.f32 %v1589_v49, %v1323_v4 }
 0x1db   : > { %v4223_v39 = vpop.f32.mrf.mxu0 }
 0x1dc   : > { %v4279_v47 = vpop.f32.mrf.mxu1  ;;  %v1677_v15 = vadd.f32 %v4223_v39, %v5316_v2 }
 0x1dd   : > { %v1669_v29 = vpop.f32.mrf.mxu0 }
 0x1de   : > { %v1992_v3 = vpop.f32.mrf.mxu1  ;;  %v1670_v13 = vadd.f32 %v1669_v29, %v5320_v59  ;;  %v5408_v7 = vadd.f32 %v4273_v50, %v1677_v15 }
 0x1df   : > { %v4226_v62 = vpop.f32.mrf.mxu0 }
 0x1e0   : > { %v4282_v12 = vpop.f32.mrf.mxu1  ;;  %v1691_v44 = vadd.f32 %v4226_v62, %v5324_v53  ;;  %v5411_v41 = vadd.f32 %v1960_v28, %v1670_v13 }
 0x1e1   : > { %v1683_v45 = vpop.f32.mrf.mxu0 }
 0x1e2   : > { %v2008_v51 = vpop.f32.mrf.mxu1  ;;  %v1684_v63 = vadd.f32 %v1683_v45, %v5328_v34  ;;  %v5414_v36 = vadd.f32 %v4276_v1, %v1691_v44 }
 0x1e3   : > { %v4229_v60 = vpop.f32.mrf.mxu0 }
 0x1e4   : > { %v4285_v2 = vpop.f32.mrf.mxu1  ;;  %v1705_v31 = vadd.f32 %v4229_v60, %v5336_v32  ;;  %v5417_v24 = vadd.f32 %v1976_v46, %v1684_v63 }
 0x1e5   : > { %v1697_v59 = vpop.f32.mrf.mxu0 }
 0x1e6   : > { %v2024_v11 = vpop.f32.mrf.mxu1  ;;  %v1698_v49 = vadd.f32 %v1697_v59, %v5339_v0  ;;  %v5420_v43 = vadd.f32 %v4279_v47, %v1705_v31  ;;  %v754_v0 = vmax.f32 %v5312_v35, %v753_v10 }
 0x1e7   : > { %v4232_v53 = vpop.f32.mrf.mxu0 }
 0x1e8   : > { %v4288_v50 = vpop.f32.mrf.mxu1  ;;  %v1719_v34 = vadd.f32 %v4232_v53, %v5344_v25  ;;  %v5424_v28 = vadd.f32 %v1992_v3, %v1698_v49  ;;  %v755_v45 = vrot.slane %v754_v0, 2 }
 0x1e9   : > { %v1711_v23 = vpop.f32.mrf.mxu0 }
 0x1ea   : > { %v2040_v1 = vpop.f32.mrf.mxu1  ;;  %v1712_v32 = vadd.f32 %v1711_v23, %v5346_v56  ;;  %v5427_v4 = vadd.f32 %v4282_v12, %v1719_v34  ;;  %v756_v49 = vmax.f32 %v754_v0, %v755_v45 }
 0x1eb   : > { %v4235_v46 = vpop.f32.mrf.mxu0 }
 0x1ec   : > { %v4291_v39 = vpop.f32.mrf.mxu1  ;;  %v1733_v47 = vadd.f32 %v4235_v46, %v5348_v17  ;;  %v5431_v15 = vadd.f32 %v2008_v51, %v1712_v32  ;;  %v757_v32 = vrot.slane %v756_v49, 1 }
 0x1ed   : > { %v1725_v29 = vpop.f32.mrf.mxu0 }
 0x1ee   : > { %v2056_v13 = vpop.f32.mrf.mxu1  ;;  %v1726_v25 = vadd.f32 %v1725_v29, %v5350_v9  ;;  %v5434_v3 = vadd.f32 %v4285_v2, %v1733_v47 }
 0x1ef   : > { %v4238_v62 = vpop.f32.mrf.mxu0 }
 0x1f0   : > { %v4294_v44 = vpop.f32.mrf.mxu1  ;;  %v1747_v56 = vadd.f32 %v4238_v62, %v5352_v16  ;;  %v5437_v12 = vadd.f32 %v2024_v11, %v1726_v25  ;;  %v758_v25 = vmax.f32 %v756_v49, %v757_v32 }
 0x1f1   : > { %v1739_v63 = vpop.f32.mrf.mxu0 }
 0x1f2   : > { %v2072_v60 = vpop.f32.mrf.mxu1  ;;  %v1740_v31 = vadd.f32 %v1739_v63, %v5354_v42  ;;  %v5440_v17 = vadd.f32 %v4288_v50, %v1747_v56 }
 0x1f3   : > { %v4241_v51 = vpop.f32.mrf.mxu0 }
 0x1f4   : > { %v4297_v59 = vpop.f32.mrf.mxu1  ;;  %v1761_v9 = vadd.f32 %v4241_v51, %v5356_v54  ;;  %v5443_v2 = vadd.f32 %v2040_v1, %v1740_v31  ;;  %v765_v31 = vsub.f32 %v5312_v35, %v758_v25 }
 0x1f5   : > { %v1753_v53 = vpop.f32.mrf.mxu0 }
 0x1f6   : > { %v2088_v10 = vpop.f32.mrf.mxu1  ;;  %v1754_v34 = vadd.f32 %v1753_v53, %v5358_v57  ;;  %v5446_v16 = vadd.f32 %v4291_v39, %v1761_v9 }
 0x1f7   : > { %v4244_v11 = vpop.f32.mrf.mxu0 }
 0x1f8   : > { %v4300_v23 = vpop.f32.mrf.mxu1  ;;  %v1775_v42 = vadd.f32 %v4244_v11, %v5360_v22  ;;  %v5449_v50 = vadd.f32 %v2056_v13, %v1754_v34  ;;  %v767_v34 = vmul.f32 1.442695, %v765_v31 }
 0x1f9   : > { %v1767_v46 = vpop.f32.mrf.mxu0 }
 0x1fa   : > { %v2104_v47 = vpop.f32.mrf.mxu1  ;;  %v1768_v0 = vadd.f32 %v1767_v46, %v5362_v18  ;;  %v5452_v54 = vadd.f32 %v4294_v44, %v1775_v42  ;;  %4490 = vpow2.f32 %v767_v34 }
 0x1fb   : > { %v4247_v1 = vpop.f32.mrf.mxu0 }
 0x1fc   : > { %v4303_v29 = vpop.f32.mrf.mxu1  ;;  %v1789_v57 = vadd.f32 %v4247_v1, %v5364_v6  ;;  %v5455_v39 = vadd.f32 %v2072_v60, %v1768_v0 }
 0x1fd   : > { %v1781_v62 = vpop.f32.mrf.mxu0 }
 0x1fe   : > { %v2120_v45 = vpop.f32.mrf.mxu1  ;;  %v1782_v56 = vadd.f32 %v1781_v62, %v5366_v33  ;;  %v5458_v22 = vadd.f32 %v4297_v59, %v1789_v57 }
 0x1ff   : > { %v4250_v13 = vpop.f32.mrf.mxu0 }
 0x200   : > { %6382 = vst [vmem:[#allocation13_spill] sm:$0xff] %v5458_v22  ;;  %v4306_v63 = vpop.f32.mrf.mxu1  ;;  %v1803_v18 = vadd.f32 %v4250_v13, %v5368_v27  ;;  %v5462_v44 = vadd.f32 %v2088_v10, %v1782_v56 }
 0x201   : > { %v1795_v51 = vpop.f32.mrf.mxu0 }
 0x202   : > { %6383 = vst [vmem:[#allocation16_spill] sm:$0xff] %v5462_v44  ;;  %v2136_v49 = vpop.f32.mrf.mxu1  ;;  %v1796_v6 = vadd.f32 %v1795_v51, %v5372_v55  ;;  %v5465_v60 = vadd.f32 %v4300_v23, %v1803_v18 }
 0x203   : > { %v4253_v9 = vpop.f32.mrf.mxu0 }
 0x204   : > { %v4309_v53 = vpop.f32.mrf.mxu1  ;;  %v1817_v33 = vadd.f32 %v4253_v9, %v5378_v37  ;;  %v5468_v59 = vadd.f32 %v2104_v47, %v1796_v6 }
 0x205   : > { %v1809_v11 = vpop.f32.mrf.mxu0 }
 0x206   : > { %6384 = vst [vmem:[#allocation11_spill] sm:$0xff] %v5468_v59  ;;  %v2152_v32 = vpop.f32.mrf.mxu1  ;;  %v1810_v35 = vadd.f32 %v1809_v11, %v5381_v19  ;;  %v5471_v27 = vadd.f32 %v4303_v29, %v1817_v33 }
 0x207   : > { %v4256_v10 = vpop.f32.mrf.mxu0 }
 0x208   : > { %v4312_v42 = vpop.f32.mrf.mxu1  ;;  %v1831_v55 = vadd.f32 %v4256_v10, %v5386_v14  ;;  %v5474_v23 = vadd.f32 %v2120_v45, %v1810_v35 }
 0x209   : > { %v1823_v46 = vpop.f32.mrf.mxu0 }
 0x20a   : > { %6385 = vst [vmem:[#allocation12_spill] sm:$0xff] %v5474_v23  ;;  %v2168_v0 = vpop.f32.mrf.mxu1  ;;  %v1824_v1 = vadd.f32 %v1823_v46, %v5388_v48  ;;  %v5477_v37 = vadd.f32 %v4306_v63, %v1831_v55 }
 0x20b   : > { %v4259_v47 = vpop.f32.mrf.mxu0 }
 0x20c   : > { %v4315_v25 = vpop.f32.mrf.mxu1  ;;  %v1845_v57 = vadd.f32 %v4259_v47, %v5390_v61  ;;  %v5480_v19 = vadd.f32 %v2136_v49, %v1824_v1 }
 0x20d   : > { %v1837_v29 = vpop.f32.mrf.mxu0 }
 0x20e   : > { %v2184_v62 = vpop.f32.mrf.mxu1  ;;  %v1838_v56 = vadd.f32 %v1837_v29, %v5392_v30  ;;  %v5483_v13 = vadd.f32 %v4309_v53, %v1845_v57  ;;  %v5498_v53 = vpop.eup %4490 }
 0x20f   : > { %v4262_v14 = vpop.f32.mrf.mxu0  ;;  %v771_v10 = vrot.slane %v5498_v53, 4 }
 0x210   : > { %v5485_v45 = vpop.f32.mrf.mxu1  ;;  %v1859_v31 = vadd.f32 %v4262_v14, %v5394_v38  ;;  %v5488_v48 = vadd.f32 %v2152_v32, %v1838_v56 }
 0x211   : > { %v1851_v63 = vpop.f32.mrf.mxu0  ;;  %v772_v1 = vadd.f32 %v5498_v53, %v771_v10 }
 0x212   : > { %v5490_v18 = vpop.f32.mrf.mxu1  ;;  %v1852_v61 = vadd.f32 %v1851_v63, %v5396_v20  ;;  %v5493_v51 = vadd.f32 %v4312_v42, %v1859_v31 }
 0x213   : > { %v4265_v49 = vpop.f32.mrf.mxu0  ;;  %v773_v31 = vrot.slane %v772_v1, 2 }
 0x214   : > { %v4373_v6 = vpop.f32.mrf.mxu1  ;;  %v1873_v30 = vadd.f32 %v4265_v49, %v5398_v58  ;;  %v5496_v9 = vadd.f32 %v2168_v0, %v1852_v61 }
 0x215   : > { %v1865_v34 = vpop.f32.mrf.mxu0 }
 0x216   : > { %v2540_v33 = vpop.f32.mrf.mxu1  ;;  %v1866_v38 = vadd.f32 %v1865_v34, %v5400_v40  ;;  %v5501_v11 = vadd.f32 %v4315_v25, %v1873_v30 }
 0x217   : > { %v5503_v32 = vpop.f32.mrf.mxu0 }
 0x218   : > { %v4376_v35 = vpop.f32.mrf.mxu1  ;;  %v5505_v20 = vadd.f32 %v2184_v62, %v1866_v38  ;;  %v1887_v23 = vadd.f32 %v5503_v32, %v5402_v26 }
 0x219   : > { %v5508_v42 = vpop.f32.mrf.mxu0 }
 0x21a   : > { %v2552_v58 = vpop.f32.mrf.mxu1  ;;  %v2209_v32 = vadd.f32 %v5485_v45, %v1887_v23 }
 0x21b   : > { %v4323_v55 = vpop.f32.mrf.mxu0 }
 0x21c   : > { %v4379_v46 = vpop.f32.mrf.mxu1  ;;  %v2289_v0 = vadd.f32 %v4323_v55, %v5408_v7 }
 0x21d   : > { %v2282_v47 = vpop.f32.mrf.mxu0 }
 0x21e   : > { %v2564_v40 = vpop.f32.mrf.mxu1  ;;  %v5512_v25 = vadd.f32 %v4373_v6, %v2289_v0  ;;  %v2283_v57 = vadd.f32 %v2282_v47, %v5411_v41  ;;  %v774_v6 = vadd.f32 %v773_v31, %v772_v1 }
 0x21f   : > { %v4326_v29 = vpop.f32.mrf.mxu0 }
 0x220   : > { %6386 = vst [vmem:[#allocation14_spill] sm:$0xff] %v5512_v25  ;;  %v4382_v62 = vpop.f32.mrf.mxu1  ;;  %v5515_v56 = vadd.f32 %v2540_v33, %v2283_v57  ;;  %v2301_v14 = vadd.f32 %v4326_v29, %v5414_v36 }
 0x221   : > { %v2294_v63 = vpop.f32.mrf.mxu0 }
 0x222   : > { %6387 = vst [vmem:[#allocation15_spill] sm:$0xff] %v5515_v56  ;;  %v2576_v61 = vpop.f32.mrf.mxu1  ;;  %v5518_v49 = vadd.f32 %v4376_v35, %v2301_v14  ;;  %v2295_v7 = vadd.f32 %v2294_v63, %v5417_v24  ;;  %v775_v24 = vrot.slane %v774_v6, 1 }
 0x223   : > { %v4329_v30 = vpop.f32.mrf.mxu0 }
 0x224   : > { %v4385_v34 = vpop.f32.mrf.mxu1  ;;  %v5521_v38 = vadd.f32 %v2552_v58, %v2295_v7  ;;  %v2313_v41 = vadd.f32 %v4329_v30, %v5420_v43 }
 0x225   : > { %v2306_v10 = vpop.f32.mrf.mxu0 }
 0x226   : > { %v2588_v55 = vpop.f32.mrf.mxu1  ;;  %v2307_v33 = vadd.f32 %v2306_v10, %v5424_v28  ;;  %v5525_v0 = vadd.f32 %v4379_v46, %v2313_v41  ;;  %v776_v28 = vadd.f32 %v775_v24, %v774_v6 }
 0x227   : > { %v4332_v36 = vpop.f32.mrf.mxu0 }
 0x228   : > { %v4388_v47 = vpop.f32.mrf.mxu1  ;;  %v5527_v57 = vadd.f32 %v2564_v40, %v2307_v33  ;;  %v2325_v35 = vadd.f32 %v4332_v36, %v5427_v4  ;;  %4492 = vrcp.f32 %v776_v28 }
 0x229   : > { %v2318_v29 = vpop.f32.mrf.mxu0 }
 0x22a   : > { %v2600_v14 = vpop.f32.mrf.mxu1  ;;  %v5530_v58 = vadd.f32 %v4382_v62, %v2325_v35  ;;  %v2319_v1 = vadd.f32 %v2318_v29, %v5431_v15  ;;  %v5615_v45 = vand.u32 4294901760, %v5527_v57 }
 0x22b   : > { %v4335_v43 = vpop.f32.mrf.mxu0 }
 0x22c   : > { %v4391_v31 = vpop.f32.mrf.mxu1  ;;  %v5533_v63 = vadd.f32 %v2576_v61, %v2319_v1  ;;  %v5596_v26 = vand.u32 4294901760, %v5530_v58  ;;  %6405 = vst [vmem:[#allocation34_spill] sm:$0xff] %v5615_v45 }
 0x22d   : > { %v2330_v46 = vpop.f32.mrf.mxu0 }
 0x22e   : > { %v2612_v7 = vpop.f32.mrf.mxu1  ;;  %6401 = vst [vmem:[#allocation30_spill] sm:$0xff] %v5596_v26 }
 0x22f   : > { %v4338_v30 = vpop.f32.mrf.mxu0 }
 0x230   : > { %v5535_v41 = vpop.f32.mrf.mxu1  ;;  %v2349_v59 = vadd.f32 %v4338_v30, %v5440_v17 }
 0x231   : > { %v2342_v40 = vpop.f32.mrf.mxu0 }
 0x232   : > { %v5537_v4 = vpop.f32.mrf.mxu1 }
 0x233   : > { %v4341_v10 = vpop.f32.mrf.mxu0 }
 0x234   : > { %v5539_v33 = vpop.f32.mrf.mxu1 }
 0x235   : > { %6388 = vst [vmem:[#allocation17_spill] sm:$0xff] %v5539_v33  ;;  %v2354_v62 = vpop.f32.mrf.mxu0  ;;  %v4493_v1 = vpop.eup %4492 }
 0x236   : > { %v5541_v36 = vpop.f32.mrf.mxu1  ;;  %v2355_v30 = vadd.f32 %v2354_v62, %v5449_v50 }
 0x237   : > { %6389 = vst [vmem:[#allocation18_spill] sm:$0xff] %v5541_v36  ;;  %v4344_v15 = vpop.f32.mrf.mxu0  ;;  %v784_v36 = vmul.f32 %v4493_v1, %v5498_v53  ;;  %v2331_v53 = vadd.f32 %v2330_v46, %v5437_v12  ;;  %v2343_v1 = vadd.f32 %v2342_v40, %v5443_v2  ;;  %v1880_v12 = vadd.f32 %v5508_v42, %v5404_v5 }
 0x238   : > { %v5543_v35 = vpop.f32.mrf.mxu1  ;;  %v2373_v5 = vadd.f32 %v4344_v15, %v5452_v54  ;;  %v5623_v15 = vand.u32 4294901760, %v5512_v25 }
 0x239   : > { %6390 = vst [vmem:[#allocation19_spill] sm:$0xff] %v5543_v35  ;;  %v2366_v61 = vpop.f32.mrf.mxu0  ;;  %v5568_v22 = vand.u32 4294901760, %v784_v36  ;;  %v2589_v2 = vadd.f32 %v2588_v55, %v2331_v53  ;;  %v5606_v55 = vand.u32 4294901760, %v5518_v49  ;;  %v2201_v23 = vadd.f32 %v5490_v18, %v1880_v12 }
 0x23a   : > { %v5545_v6 = vpop.f32.mrf.mxu1  ;;  %v2367_v54 = vadd.f32 %v2366_v61, %v5455_v39  ;;  %6408 = vst [vmem:[#allocation37_spill] sm:$0xff] %v5623_v15  ;;  %v5630_v18 = vsub.f32 %v5530_v58, %v5596_v26  ;;  %v5633_v53 = vand.u32 4294901760, %v5533_v63  ;;  %v5649_v58 = vand.u32 4294901760, %v5521_v38 }
 0x23b   : > { %6391 = vst [vmem:[#allocation20_spill] sm:$0xff] %v5545_v6  ;;  %v5547_v24 = vpop.f32.mrf.mxu0  ;;  %6398 = vst [vmem:[#allocation27_spill] sm:$0xff] %v5568_v22 }
 0x23c   : > { %6392 = vst [vmem:[#allocation21_spill] sm:$0xff] %v5547_v24  ;;  %v5549_v29 = vpop.f32.mrf.mxu1  ;;  %6402 = vst [vmem:[#allocation31_spill] sm:$0xff] %v5606_v55 }
 0x23d   : > { %6393 = vst [vmem:[#allocation22_spill] sm:$0xff] %v5549_v29  ;;  %v5551_v28 = vpop.f32.mrf.mxu0  ;;  %6410 = vst [vmem:[#allocation39_spill] sm:$0xff] %v5633_v53 }
 0x23e   : > { %6394 = vst [vmem:[#allocation23_spill] sm:$0xff] %v5551_v28  ;;  %v5553_v52 = vpop.f32.mrf.mxu1  ;;  %v2337_v28 = vadd.f32 %v4335_v43, %v5434_v3  ;;  %v5586_v3 = vsub.f32 %v784_v36, %v5568_v22  ;;  %v2607_v43 = vadd.f32 %v4388_v47, %v2349_v59  ;;  %v2613_v47 = vadd.f32 %v2612_v7, %v2355_v30 }
 0x23f   : > { %6395 = vst [vmem:[#allocation24_spill] sm:$0xff] %v5553_v52  ;;  %v5555_v21 = vpop.f32.mrf.mxu0  ;;  %v2631_v30 = vadd.f32 %v5535_v41, %v2373_v5  ;;  %v5646_v59 = vsub.f32 %v5518_v49, %v5606_v55  ;;  %v2625_v5 = vadd.f32 %v5537_v4, %v2367_v54 }
 0x240   : > { %v5557_v8 = vpop.f32.mrf.mxu1  ;;  %6400 = vst [vmem:[#allocation29_spill] sm:$0xff] %v5586_v3  ;;  %v2595_v17 = vadd.f32 %v4385_v34, %v2337_v28  ;;  %v5602_v50 = vand.u32 4294901760, %v2607_v43  ;;  %v5626_v28 = vand.u32 4294901760, %v5515_v56  ;;  %v5641_v61 = vand.u32 4294901760, %v2613_v47 }
 0x241   : > { %v5560_v33 = vpop.f32.mrf.mxu0  ;;  %6412 = vst [vmem:[#allocation41_spill] sm:$0xff] %v5646_v59  ;;  %v5681_v4 = vand.u32 4294901760, %v2631_v30 }
 0x242   : > { %6396 = vst [vmem:[#allocation25_spill] sm:$0xff] %v5560_v33  ;;  %v5562_v44 = vpop.f32.mrf.mxu1  ;;  %v2361_v33 = vadd.f32 %v4341_v10, %v5446_v16  ;;  %v2601_v16 = vadd.f32 %v2600_v14, %v2343_v1  ;;  %v5600_v34 = vand.u32 4294901760, %v2595_v17  ;;  %v5609_v14 = vand.u32 4294901760, %v5525_v0  ;;  %6409 = vst [vmem:[#allocation38_spill] sm:$0xff] %v5626_v28 }
 0x243   : > { %6397 = vst [vmem:[#allocation26_spill] sm:$0xff] %v5562_v44  ;;  %v5564_v6 = vpop.f32.mrf.mxu0  ;;  %v5639_v39 = vsub.f32 %v2607_v43, %v5602_v50  ;;  %6411 = vst [vmem:[#allocation40_spill] sm:$0xff] %v5641_v61  ;;  %v5660_v43 = vsub.f32 %v5527_v57, %v5615_v45 }
 0x244   : > { %v5566_v24 = vpop.f32.mrf.mxu1  ;;  %v2619_v46 = vadd.f32 %v4391_v31, %v2361_v33  ;;  %6403 = vst [vmem:[#allocation32_spill] sm:$0xff] %v5609_v14  ;;  %v5611_v31 = vand.u32 4294901760, %v2589_v2  ;;  %v5617_v33 = vand.u32 4294901760, %v2601_v16  ;;  %v5636_v1 = vsub.f32 %v2595_v17, %v5600_v34 }
 0x245   : > { %v5572_v35 = vpop.f32.mrf.mxu0  ;;  %v5653_v22 = vsub.f32 %v5525_v0, %v5609_v14 }
 0x246   : > { %6399 = vst [vmem:[#allocation28_spill] sm:$0xff] %v5572_v35  ;;  %v5574_v52 = vpop.f32.mrf.mxu1  ;;  %6404 = vst [vmem:[#allocation33_spill] sm:$0xff] %v5611_v31  ;;  %v5619_v62 = vand.u32 4294901760, %v2619_v46  ;;  %v5656_v17 = vsub.f32 %v2589_v2, %v5611_v31  ;;  %v5663_v41 = vsub.f32 %v2601_v16, %v5617_v33  ;;  %v5672_v2 = vsub.f32 %v5533_v63, %v5633_v53 }
 0x247   : > { %v5579_v29 = vpop.f32.mrf.mxu0  ;;  %6406 = vst [vmem:[#allocation35_spill] sm:$0xff] %v5617_v33 }
 0x248   : > { %v5581_v44 = vpop.f32.mrf.mxu1  ;;  %6407 = vst [vmem:[#allocation36_spill] sm:$0xff] %v5619_v62  ;;  %v5666_v49 = vsub.f32 %v2619_v46, %v5619_v62  ;;  %v5679_v46 = vsub.f32 %v2613_v47, %v5641_v61 }
 0x249   : > { %v5589_v35 = vpop.f32.mrf.mxu0 }
 0x24a   : > { %v5593_v40 = vpop.f32.mrf.mxu1 }
 0x24b   : > { %v4359_v10 = vpop.f32.mrf.mxu0 }
 0x24c   : > { %v4415_v7 = vpop.f32.mrf.mxu1 }
 0x24d   : > { %v2426_v42 = vpop.f32.mrf.mxu0 }
 0x24e   : > { %v2708_v56 = vpop.f32.mrf.mxu1 }
 0x24f   : > { %v4362_v36 = vpop.f32.mrf.mxu0 }
 0x250   : > { %v2445_v55 = vadd.f32 %v4362_v36, %v5493_v51  ;;  %v5688_v36 = vand.u32 4294901760, %v2625_v5  ;;  %v4418_v47 = vpop.f32.mrf.mxu1 }
 0x251   : > { %v2438_v12 = vpop.f32.mrf.mxu0 }
 0x252   : > { %v2439_v25 = vadd.f32 %v2438_v12, %v5496_v9  ;;  %v2703_v3 = vadd.f32 %v5581_v44, %v2445_v55  ;;  %v6278_v9 = vand.u32 4294901760, %v5679_v46 }
 0x253   : > { %v4365_v28 = vpop.f32.mrf.mxu0 }
 0x254   : > { %v2457_v57 = vadd.f32 %v4365_v28, %v5501_v11  ;;  %v6264_v11 = vand.u32 4294901760, %v5666_v49  ;;  %v2433_v28 = vadd.f32 %v4359_v10, %v5483_v13  ;;  %v2697_v10 = vadd.f32 %v5593_v40, %v2439_v25 }
 0x255   : > { %v2450_v54 = vpop.f32.mrf.mxu0 }
 0x256   : > { %v2715_v63 = vadd.f32 %v4415_v7, %v2457_v57  ;;  %v2451_v15 = vadd.f32 %v2450_v54, %v5505_v20  ;;  %v5696_v20 = vsub.f32 %v2631_v30, %v5681_v4  ;;  %v2427_v7 = vadd.f32 %v2426_v42, %v5488_v48  ;;  %v2720_v42 = vpop.f32.mrf.mxu1 }
 0x257   : > { %v4368_v16 = vpop.f32.mrf.mxu0  ;;  %v6414_v57 = vand.u32 4294901760, %v5639_v39  ;;  %v2691_v48 = vadd.f32 %v5566_v24, %v2433_v28  ;;  %v5716_v30 = vsub.f32 %v5666_v49, %v6264_v11  ;;  %v2415_v24 = vadd.f32 %v5589_v35, %v5480_v19 }
 0x258   : > { %v5692_v45 = vand.u32 4294901760, %v2715_v63  ;;  %v2709_v0 = vadd.f32 %v2708_v56, %v2451_v15  ;;  %v2469_v59 = vadd.f32 %v4368_v16, %v2209_v32  ;;  %v5708_v32 = vsub.f32 %v2625_v5, %v5688_v36 }
 0x259   : > { %v2462_v12 = vpop.f32.mrf.mxu0  ;;  %v5702_v13 = vsub.f32 %v5639_v39, %v6414_v57  ;;  %v2421_v15 = vadd.f32 %v5579_v29, %v5477_v37  ;;  %v5718_v16 = vand.u32 4294901760, %v2703_v3  ;;  %v2397_v37 = vadd.f32 %v5555_v21, %v5465_v60 }
 0x25a   : > { %6413 = vst [vmem:[#allocation42_spill] sm:$0xff] %v5692_v45  ;;  %v5705_v44 = vand.u32 4294901760, %v2709_v0  ;;  %v2727_v55 = vadd.f32 %v4418_v47, %v2469_v59  ;;  %v2463_v56 = vadd.f32 %v2462_v12, %v2201_v23  ;;  %v5721_v25 = vsub.f32 %v2715_v63, %v5692_v45  ;;  %v6417_v12 = vld [vmem:[#allocation12_spill] sm:$0xff] }
 0x25b   : > { %v6265_v23 = vand.u32 4294901760, %v5696_v20  ;;  %v2685_v29 = vadd.f32 %v5574_v52, %v2427_v7  ;;  %v5731_v5 = vand.u32 4294901760, %v2697_v10  ;;  %v6267_v47 = vand.u32 4294901760, %v5708_v32 }
 0x25c   : > { %6415 = vst [vmem:[#allocation43_spill] sm:$0xff] %v5705_v44  ;;  %v5723_v40 = vand.u32 4294901760, %v2727_v55  ;;  %v2721_v59 = vadd.f32 %v2720_v42, %v2463_v56  ;;  %v5734_v54 = vsub.f32 %v2709_v0, %v5705_v44  ;;  %v2409_v21 = vadd.f32 %v5564_v6, %v5471_v27  ;;  %v6418_v27 = vld [vmem:[#allocation28_spill] sm:$0xff] }
 0x25d   : > { %6416 = vst [vmem:[#allocation44_spill] sm:$0xff] %v5731_v5  ;;  %v2679_v60 = vadd.f32 %v5557_v8, %v2421_v15  ;;  %v5746_v52 = vand.u32 4294901760, %v2691_v48  ;;  %v5750_v19 = vsub.f32 %v2703_v3, %v5718_v16  ;;  %v6268_v7 = vand.u32 4294901760, %v5721_v25  ;;  %v6419_v8 = vld [vmem:[#allocation26_spill] sm:$0xff] }
 0x25e   : > { %v5737_v63 = vsub.f32 %v2727_v55, %v5723_v40  ;;  %v5739_v28 = vand.u32 4294901760, %v2721_v59  ;;  %3909 = vmatprep.subr.mxu0 %v5723_v40  ;;  %v2403_v6 = vadd.f32 %v6418_v27, %v6417_v12  ;;  %v2673_v57 = vadd.f32 %v6419_v8, %v2415_v24  ;;  %v6420_v24 = vld [vmem:[#allocation22_spill] sm:$0xff] }
 0x25f   : > { %3910 = vmatpush3.msra.mxu0 %v5681_v4  ;;  %v5761_v55 = vand.u32 4294901760, %v2685_v29  ;;  %v2847_v3 = vsub.f32 %v5696_v20, %v6265_v23  ;;  %v5768_v56 = vsub.f32 %v2697_v10, %v5731_v5  ;;  %v2667_v12 = vadd.f32 %v6420_v24, %v2409_v21  ;;  %v6422_v24 = vld [vmem:[#allocation24_spill] sm:$0xff] }
 0x260   : > { %v5753_v35 = vsub.f32 %v2721_v59, %v5739_v28  ;;  %3911 = vmatprep.subr.mxu0 %v5739_v28  ;;  %v6266_v0 = vand.u32 4294901760, %v5737_v63  ;;  %v5777_v27 = vand.u32 4294901760, %v2679_v60  ;;  %v5780_v8 = vsub.f32 %v2691_v48, %v5746_v52  ;;  %v6425_v48 = vld [vmem:[#allocation19_spill] sm:$0xff] }
 0x261   : > { %3912 = vmatpush3.msra.mxu0 %v5688_v36  ;;  %v2854_v10 = vsub.f32 %v5708_v32, %v6267_v47  ;;  %v2973_v21 = vsub.f32 %v5721_v25, %v6268_v7  ;;  %v5795_v51 = vand.u32 4294901760, %v2673_v57  ;;  %v2848_v47 = vand.u32 4294901760, %v2847_v3  ;;  %v6426_v3 = vld [vmem:[#allocation11_spill] sm:$0xff] }
 0x262   : > { %3913 = vmatprep.subr.mxu0 %v5692_v45  ;;  %v2959_v15 = vsub.f32 %v5737_v63, %v6266_v0  ;;  %v6269_v42 = vand.u32 4294901760, %v5753_v35  ;;  %6421 = vst [vmem:[#allocation12_spill] sm:$0xff] %v5777_v27  ;;  %v2661_v0 = vadd.f32 %v6422_v24, %v2403_v6  ;;  %v5802_v59 = vsub.f32 %v2685_v29, %v5761_v55 }
 0x263   : > { %3914 = vmatpush3.msra.mxu0 %v5619_v62  ;;  %6423 = vst [vmem:[#allocation28_spill] sm:$0xff] %v5795_v51  ;;  %v5812_v45 = vand.u32 4294901760, %v2667_v12  ;;  %v2855_v29 = vand.u32 4294901760, %v2854_v10  ;;  %v5833_v10 = vsub.f32 %v2673_v57, %v5795_v51 }
 0x264   : > { %3915 = vmatprep.subr.mxu0 %v5705_v44  ;;  %v2960_v11 = vand.u32 4294901760, %v2959_v15  ;;  %v2966_v23 = vsub.f32 %v5753_v35, %v6269_v42  ;;  %v2868_v15 = vsub.f32 %v5679_v46, %v6278_v9  ;;  %v6424_v42 = vand.u32 4294901760, %v5734_v54  ;;  %v6427_v44 = vld [vmem:[#allocation25_spill] sm:$0xff] }
 0x265   : > { %3916 = vmatpush3.msra.mxu0 %v5641_v61  ;;  %v2655_v61 = vadd.f32 %v6425_v48, %v2397_v37  ;;  %v2391_v62 = vadd.f32 %v6427_v44, %v6426_v3  ;;  %6428 = vst [vmem:[#allocation26_spill] sm:$0xff] %v5812_v45  ;;  %v6430_v44 = vld [vmem:[#allocation13_spill] sm:$0xff]  ;;  %v5825_v24 = vand.u32 4294901760, %v2661_v0  ;;  %v6436_v48 = vld [vmem:[#allocation23_spill] sm:$0xff] }
 0x266   : > { %3917 = vmatprep.subr.mxu0 %v5718_v16  ;;  %3944 = vmatprep.subr.mxu1 %v2960_v11  ;;  %v2967_v7 = vand.u32 4294901760, %v2966_v23  ;;  %v2980_v6 = vsub.f32 %v5734_v54, %v6424_v42  ;;  %v5816_v11 = vsub.f32 %v2679_v60, %v5777_v27  ;;  %v2974_v23 = vand.u32 4294901760, %v2973_v21  ;;  %v6431_v3 = vld [vmem:[#allocation21_spill] sm:$0xff] }
 0x267   : > { %3918 = vmatpush3.msra.mxu0 %v5602_v50  ;;  %3945 = vmatpush3.msra.mxu1 %v2848_v47  ;;  %v6429_v42 = vand.u32 4294901760, %v5750_v19  ;;  %v2385_v9 = vadd.f32 %v6431_v3, %v6430_v44  ;;  %6432 = vst [vmem:[#allocation22_spill] sm:$0xff] %v5825_v24  ;;  %v2862_v47 = vand.u32 4294901760, %v5716_v30  ;;  %v6433_v60 = vand.u32 4294901760, %v5663_v41 }
 0x268   : > { %3919 = vmatprep.subr.mxu0 %v5731_v5  ;;  %3946 = vmatprep.subr.mxu1 %v2967_v7  ;;  %v2981_v21 = vand.u32 4294901760, %v2980_v6  ;;  %v6438_v5 = vld [vmem:[#allocation20_spill] sm:$0xff]  ;;  %v2869_v57 = vand.u32 4294901760, %v2868_v15  ;;  %v6441_v15 = vand.u32 4294901760, %v5636_v1 }
 0x269   : > { %v2987_v37 = vsub.f32 %v5750_v19, %v6429_v42  ;;  %3920 = vmatpush3.msra.mxu0 %v5617_v33  ;;  %3947 = vmatpush3.msra.mxu1 %v2855_v29  ;;  %v2882_v7 = vsub.f32 %v5663_v41, %v6433_v60  ;;  %v6434_v42 = vand.u32 4294901760, %v5768_v56  ;;  %v6435_v29 = vld [vmem:[#allocation16_spill] sm:$0xff]  ;;  %v5842_v33 = vand.u32 4294901760, %v2655_v61 }
 0x26a   : > { %3921 = vmatprep.subr.mxu0 %v5746_v52  ;;  %3948 = vmatprep.subr.mxu1 %v2974_v23  ;;  %v2379_v30 = vadd.f32 %v6436_v48, %v6435_v29  ;;  %v2649_v60 = vadd.f32 %v6438_v5, %v2391_v62  ;;  %v5847_v23 = vsub.f32 %v2667_v12, %v5812_v45  ;;  %v6440_v62 = vld [vmem:[#allocation17_spill] sm:$0xff]  ;;  %v2876_v12 = vand.u32 4294901760, %v5702_v13 }
 0x26b   : > { %v2994_v44 = vsub.f32 %v5768_v56, %v6434_v42  ;;  %6437 = vst [vmem:[#allocation24_spill] sm:$0xff] %v5842_v33  ;;  %3922 = vmatpush3.msra.mxu0 %v5600_v34  ;;  %3949 = vmatpush3.msra.mxu1 %v2862_v47  ;;  %v2988_v6 = vand.u32 4294901760, %v2987_v37  ;;  %v6439_v42 = vand.u32 4294901760, %v5780_v8  ;;  %v2643_v5 = vadd.f32 %v6440_v62, %v2385_v9 }
 0x26c   : > { %3923 = vmatprep.subr.mxu0 %v5761_v55  ;;  %3950 = vmatprep.subr.mxu1 %v2981_v21  ;;  %v2889_v47 = vsub.f32 %v5636_v1, %v6441_v15  ;;  %v5862_v37 = vsub.f32 %v2661_v0, %v5825_v24  ;;  %v5870_v13 = vand.u32 4294901760, %v2649_v60  ;;  %v2883_v15 = vand.u32 4294901760, %v2882_v7 }
 0x26d   : > { %v3001_v3 = vsub.f32 %v5780_v8, %v6439_v42  ;;  %3924 = vmatpush3.msra.mxu0 %v5611_v31  ;;  %3951 = vmatpush3.msra.mxu1 %v2869_v57  ;;  %v2995_v21 = vand.u32 4294901760, %v2994_v44  ;;  %v6442_v42 = vand.u32 4294901760, %v5802_v59  ;;  %v6443_v57 = vld [vmem:[#allocation18_spill] sm:$0xff]  ;;  %v6444_v0 = vand.u32 4294901760, %v5656_v17 }
 0x26e   : > { %3925 = vmatprep.subr.mxu0 %v5777_v27  ;;  %3952 = vmatprep.subr.mxu1 %v2988_v6  ;;  %v2637_v29 = vadd.f32 %v6443_v57, %v2379_v30  ;;  %v5877_v44 = vsub.f32 %v2655_v61, %v5842_v33  ;;  %v5885_v7 = vand.u32 4294901760, %v2643_v5  ;;  %v6446_v61 = vand.u32 4294901760, %v5630_v18  ;;  %v6459_v57 = vld [vmem:[#allocation29_spill] sm:$0xff]  ;;  %v6464_v27 = vld [vmem:[#allocation15_spill] sm:$0xff] }
 0x26f   : > { %v3008_v9 = vsub.f32 %v5802_v59, %v6442_v42  ;;  %3926 = vmatpush3.msra.mxu0 %v5596_v26  ;;  %3953 = vmatpush3.msra.mxu1 %v2876_v12  ;;  %v2896_v48 = vsub.f32 %v5656_v17, %v6444_v0  ;;  %v3002_v6 = vand.u32 4294901760, %v3001_v3  ;;  %v6445_v42 = vand.u32 4294901760, %v5816_v11 }
 0x270   : > { %3927 = vmatprep.subr.mxu0 %v5795_v51  ;;  %3954 = vmatprep.subr.mxu1 %v2995_v21  ;;  %v2890_v0 = vand.u32 4294901760, %v2889_v47  ;;  %v2903_v62 = vsub.f32 %v5630_v18, %v6446_v61  ;;  %v5897_v51 = vand.u32 4294901760, %v2637_v29  ;;  %v5900_v47 = vsub.f32 %v2649_v60, %v5870_v13 }
 0x271   : > { %v3015_v30 = vsub.f32 %v5816_v11, %v6445_v42  ;;  %3928 = vmatpush3.msra.mxu0 %v5633_v53  ;;  %3955 = vmatpush3.msra.mxu1 %v2883_v15  ;;  %v3009_v21 = vand.u32 4294901760, %v3008_v9  ;;  %v6447_v42 = vand.u32 4294901760, %v5833_v10  ;;  %v2897_v15 = vand.u32 4294901760, %v2896_v48 }
 0x272   : > { %3929 = vmatprep.subr.mxu0 %v5812_v45  ;;  %3956 = vmatprep.subr.mxu1 %v3002_v6  ;;  %v6448_v61 = vand.u32 4294901760, %v5672_v2  ;;  %v5908_v9 = vsub.f32 %v5521_v38, %v5649_v58  ;;  %v6450_v3 = vand.u32 4294901760, %v5847_v23  ;;  %v2904_v38 = vand.u32 4294901760, %v2903_v62 }
 0x273   : > { %v3022_v12 = vsub.f32 %v5833_v10, %v6447_v42  ;;  %3930 = vmatpush3.msra.mxu0 %v5609_v14  ;;  %3957 = vmatpush3.msra.mxu1 %v2890_v0  ;;  %v3016_v42 = vand.u32 4294901760, %v3015_v30  ;;  %v6451_v0 = vld [vmem:[#allocation41_spill] sm:$0xff]  ;;  %v5917_v14 = vsub.f32 %v2643_v5, %v5885_v7  ;;  %v6454_v45 = vand.u32 4294901760, %v5653_v22 }
 0x274   : > { %v2910_v6 = vsub.f32 %v5672_v2, %v6448_v61  ;;  %6449 = vst [vmem:[#allocation19_spill] sm:$0xff] %v5908_v9  ;;  %3931 = vmatprep.subr.mxu0 %v5825_v24  ;;  %3958 = vmatprep.subr.mxu1 %v3009_v21  ;;  %v3029_v60 = vsub.f32 %v5847_v23, %v6450_v3  ;;  %v6453_v61 = vld [vmem:[#allocation34_spill] sm:$0xff]  ;;  %v6455_v30 = vld [vmem:[#allocation37_spill] sm:$0xff]  ;;  %v6458_v48 = vand.u32 4294901760, %v5862_v37  ;;  %v6462_v26 = vand.u32 4294901760, %v5660_v43 }
 0x275   : > { %6452 = vst [vmem:[#allocation11_spill] sm:$0xff] %v5917_v14  ;;  %3932 = vmatpush3.msra.mxu0 %v6453_v61  ;;  %3959 = vmatpush3.msra.mxu1 %v2897_v15  ;;  %v2917_v21 = vsub.f32 %v5653_v22, %v6454_v45  ;;  %v6456_v24 = vld [vmem:[#allocation14_spill] sm:$0xff]  ;;  %v3023_v3 = vand.u32 4294901760, %v3022_v12  ;;  %v6460_v61 = vand.u32 4294901760, %v6459_v57  ;;  %v5935_v15 = vsub.f32 %v2637_v29, %v5897_v51  ;;  %v6461_v45 = vld [vmem:[#allocation31_spill] sm:$0xff] }
 0x276   : > { %v5925_v53 = vsub.f32 %v6456_v24, %v6455_v30  ;;  %3933 = vmatprep.subr.mxu0 %v5842_v33  ;;  %3960 = vmatprep.subr.mxu1 %v3016_v42  ;;  %v3036_v5 = vsub.f32 %v5862_v37, %v6458_v48  ;;  %v2911_v24 = vand.u32 4294901760, %v2910_v6  ;;  %v2924_v42 = vsub.f32 %v5660_v43, %v6462_v26  ;;  %v6463_v33 = vld [vmem:[#allocation38_spill] sm:$0xff] }
 0x277   : > { %v2836_v62 = vsub.f32 %v6459_v57, %v6460_v61  ;;  %3934 = vmatpush3.msra.mxu0 %v6461_v45  ;;  %3961 = vmatpush3.msra.mxu1 %v2904_v38  ;;  %v5944_v48 = vsub.f32 %v6464_v27, %v6463_v33  ;;  %v3030_v29 = vand.u32 4294901760, %v3029_v60  ;;  %v6466_v61 = vand.u32 4294901760, %v5877_v44 }
 0x278   : > { %6457 = vst [vmem:[#allocation25_spill] sm:$0xff] %v5925_v53  ;;  %3935 = vmatprep.subr.mxu0 %v5870_v13  ;;  %3962 = vmatprep.subr.mxu1 %v3023_v3  ;;  %v2918_v26 = vand.u32 4294901760, %v2917_v21  ;;  %v6467_v38 = vand.u32 4294901760, %v6451_v0  ;;  %v3037_v60 = vand.u32 4294901760, %v3036_v5  ;;  %v2925_v3 = vand.u32 4294901760, %v2924_v42 }
 0x279   : > { %6465 = vst [vmem:[#allocation13_spill] sm:$0xff] %v5944_v48  ;;  %v3043_v6 = vsub.f32 %v5877_v44, %v6466_v61  ;;  %3936 = vmatpush3.msra.mxu0 %v5649_v58  ;;  %3963 = vmatpush3.msra.mxu1 %v2911_v24  ;;  %v6468_v61 = vand.u32 4294901760, %v5900_v47  ;;  %v6301_v24 = vand.u32 4294901760, %v5935_v15  ;;  %v2837_v31 = vand.u32 4294901760, %v2836_v62 }
 0x27a   : > { %v2931_v12 = vsub.f32 %v6451_v0, %v6467_v38  ;;  %3937 = vmatprep.subr.mxu0 %v5885_v7  ;;  %3964 = vmatprep.subr.mxu1 %v3030_v29  ;;  %v6469_v29 = vand.u32 4294901760, %v5908_v9  ;;  %v6471_v38 = vand.u32 4294901760, %v5925_v53 }
 0x27b   : > { %3938 = vmatpush3.msra.mxu0 %v6455_v30  ;;  %3965 = vmatpush3.msra.mxu1 %v2918_v26  ;;  %v3050_v21 = vsub.f32 %v5900_v47, %v6468_v61  ;;  %v3044_v27 = vand.u32 4294901760, %v3043_v6  ;;  %v6470_v26 = vand.u32 4294901760, %v5917_v14  ;;  %v3064_v6 = vsub.f32 %v5935_v15, %v6301_v24  ;;  %v6489_v24 = vld [vmem:[#allocation22_spill] sm:$0xff] }
 0x27c   : > { %3939 = vmatprep.subr.mxu0 %v5897_v51  ;;  %3966 = vmatprep.subr.mxu1 %v3037_v60  ;;  %v2938_v5 = vsub.f32 %v5908_v9, %v6469_v29  ;;  %v2932_v42 = vand.u32 4294901760, %v2931_v12  ;;  %v2945_v60 = vsub.f32 %v5925_v53, %v6471_v38  ;;  %v6472_v12 = vld [vmem:[#allocation10_spill] sm:$0xff] }
 0x27d   : > { %3940 = vmatpush3.msra.mxu0 %v6463_v33  ;;  %3967 = vmatpush3.msra.mxu1 %v2925_v3  ;;  %v3057_v61 = vsub.f32 %v5917_v14, %v6470_v26  ;;  %v3051_v62 = vand.u32 4294901760, %v3050_v21  ;;  %v3065_v29 = vand.u32 4294901760, %v3064_v6  ;;  %v6475_v26 = vand.u32 4294901760, %v6472_v12  ;;  %v6479_v6 = vld [vmem:[#allocation40_spill] sm:$0xff] }
 0x27e   : > { %2838 = vmatmul.mubr.f32.vlgmr.msra.gmra.mxu0 %v2837_v31  ;;  %3968 = vmatprep.subr.mxu1 %v3044_v27  ;;  %v2939_v3 = vand.u32 4294901760, %v2938_v5  ;;  %v6473_v31 = vand.u32 4294901760, %v5944_v48  ;;  %v2946_v21 = vand.u32 4294901760, %v2945_v60  ;;  %v6477_v60 = vld [vmem:[#allocation36_spill] sm:$0xff] }
 0x27f   : > { %3979 = vmatprep.subr.mxu0 %v5737_v63  ;;  %3969 = vmatpush3.msra.mxu1 %v2932_v42  ;;  %v3058_v38 = vand.u32 4294901760, %v3057_v61  ;;  %v6474_v42 = vld [vmem:[#allocation27_spill] sm:$0xff]  ;;  %v6476_v61 = vld [vmem:[#allocation42_spill] sm:$0xff] }
 0x280   : > { %3980 = vmatpush3.msra.mxu0 %v5696_v20  ;;  %3205 = vmatprep.mubr.f32.mxu0 %v6472_v12  ;;  %v2952_v27 = vsub.f32 %v5944_v48, %v6473_v31  ;;  %v6480_v12 = vld [vmem:[#allocation44_spill] sm:$0xff]  ;;  %v6482_v31 = vld [vmem:[#allocation33_spill] sm:$0xff] }
 0x281   : > { %3970 = vmatprep.subr.mxu1 %v3051_v62  ;;  %3981 = vmatprep.subr.mxu0 %v5753_v35  ;;  %v6478_v62 = vld [vmem:[#allocation43_spill] sm:$0xff] }
 0x282   : > { %3971 = vmatpush3.msra.mxu1 %v2939_v3  ;;  %3982 = vmatpush3.msra.mxu0 %v5708_v32  ;;  %v2953_v5 = vand.u32 4294901760, %v2952_v27  ;;  %v6481_v3 = vld [vmem:[#allocation35_spill] sm:$0xff]  ;;  %v6483_v27 = vld [vmem:[#allocation12_spill] sm:$0xff] }
 0x283   : > { %3972 = vmatprep.subr.mxu1 %v3058_v38  ;;  %3983 = vmatprep.subr.mxu0 %v5721_v25  ;;  %v6484_v38 = vld [vmem:[#allocation30_spill] sm:$0xff] }
 0x284   : > { %3973 = vmatpush3.msra.mxu1 %v2946_v21  ;;  %3984 = vmatpush3.msra.mxu0 %v5666_v49  ;;  %v6485_v21 = vld [vmem:[#allocation28_spill] sm:$0xff] }
 0x285   : > { %3974 = vmatprep.subr.mxu1 %v3065_v29  ;;  %3985 = vmatprep.subr.mxu0 %v5734_v54  ;;  %v6486_v29 = vld [vmem:[#allocation39_spill] sm:$0xff] }
 0x286   : > { %3975 = vmatpush3.msra.mxu1 %v2953_v5  ;;  %3986 = vmatpush3.msra.mxu0 %v5679_v46  ;;  %v6487_v5 = vld [vmem:[#allocation26_spill] sm:$0xff] }
 0x287   : > { %3070 = vmatmul.mubr.f32.vlgmr.msra.gmra.mxu1 %v6474_v42  ;;  %3987 = vmatprep.subr.mxu0 %v5750_v19  ;;  %v6490_v42 = vld [vmem:[#allocation34_spill] sm:$0xff] }
 0x288   : > { %4014 = vmatprep.subr.mxu1 %v5723_v40  ;;  %3988 = vmatpush3.msra.mxu0 %v5639_v39 }
 0x289   : > { %4015 = vmatpush3.msra.mxu1 %v5681_v4  ;;  %3312 = vmatprep.mubr.f32.mxu1 %v6475_v26  ;;  %v6488_v26 = vld [vmem:[#allocation32_spill] sm:$0xff] }
 0x28a   : > { %3989 = vmatprep.subr.mxu0 %v5768_v56  ;;  %4016 = vmatprep.subr.mxu1 %v5739_v28 }
 0x28b   : > { %3990 = vmatpush3.msra.mxu0 %v5663_v41  ;;  %4017 = vmatpush3.msra.mxu1 %v5688_v36 }
 0x28c   : > { %3991 = vmatprep.subr.mxu0 %v5780_v8  ;;  %4018 = vmatprep.subr.mxu1 %v6476_v61 }
 0x28d   : > { %3992 = vmatpush3.msra.mxu0 %v5636_v1  ;;  %4019 = vmatpush3.msra.mxu1 %v6477_v60 }
 0x28e   : > { %3993 = vmatprep.subr.mxu0 %v5802_v59  ;;  %4020 = vmatprep.subr.mxu1 %v6478_v62 }
 0x28f   : > { %3994 = vmatpush3.msra.mxu0 %v5656_v17  ;;  %4021 = vmatpush3.msra.mxu1 %v6479_v6 }
 0x290   : > { %3995 = vmatprep.subr.mxu0 %v5816_v11  ;;  %4022 = vmatprep.subr.mxu1 %v5718_v16 }
 0x291   : > { %3996 = vmatpush3.msra.mxu0 %v5630_v18  ;;  %4023 = vmatpush3.msra.mxu1 %v5602_v50 }
 0x292   : > { %3997 = vmatprep.subr.mxu0 %v5833_v10  ;;  %4024 = vmatprep.subr.mxu1 %v6480_v12 }
 0x293   : > { %3998 = vmatpush3.msra.mxu0 %v5672_v2  ;;  %4025 = vmatpush3.msra.mxu1 %v6481_v3 }
 0x294   : > { %3999 = vmatprep.subr.mxu0 %v5847_v23  ;;  %4026 = vmatprep.subr.mxu1 %v5746_v52 }
 0x295   : > { %4000 = vmatpush3.msra.mxu0 %v5653_v22  ;;  %4027 = vmatpush3.msra.mxu1 %v5600_v34 }
 0x296   : > { %4001 = vmatprep.subr.mxu0 %v5862_v37  ;;  %4028 = vmatprep.subr.mxu1 %v5761_v55 }
 0x297   : > { %4002 = vmatpush3.msra.mxu0 %v5660_v43  ;;  %4029 = vmatpush3.msra.mxu1 %v6482_v31 }
 0x298   : > { %4003 = vmatprep.subr.mxu0 %v5877_v44  ;;  %4030 = vmatprep.subr.mxu1 %v6483_v27 }
 0x299   : > { %4004 = vmatpush3.msra.mxu0 %v6451_v0  ;;  %4031 = vmatpush3.msra.mxu1 %v6484_v38 }
 0x29a   : > { %4005 = vmatprep.subr.mxu0 %v5900_v47  ;;  %4032 = vmatprep.subr.mxu1 %v6485_v21 }
 0x29b   : > { %4006 = vmatpush3.msra.mxu0 %v5908_v9  ;;  %4033 = vmatpush3.msra.mxu1 %v6486_v29  ;;  %v6491_v9 = vld [vmem:[#allocation24_spill] sm:$0xff] }
 0x29c   : > { %4007 = vmatprep.subr.mxu0 %v5917_v14  ;;  %4034 = vmatprep.subr.mxu1 %v6487_v5  ;;  %v6492_v14 = vand.u32 4294901760, %v5737_v63  ;;  %v6501_v63 = vand.u32 4294901760, %v6459_v57 }
 0x29d   : > { %4008 = vmatpush3.msra.mxu0 %v5925_v53  ;;  %4035 = vmatpush3.msra.mxu1 %v6488_v26  ;;  %v6493_v53 = vand.u32 4294901760, %v5696_v20  ;;  %v6494_v26 = vld [vmem:[#allocation9_spill] sm:$0xff]  ;;  %v6499_v20 = vand.u32 4294901760, %v5734_v54  ;;  %v6504_v54 = vand.u32 4294901760, %v5768_v56 }
 0x29e   : > { %4009 = vmatprep.subr.mxu0 %v5935_v15  ;;  %4036 = vmatprep.subr.mxu1 %v6489_v24  ;;  %v6525_v56 = vld [vmem:[#allocation25_spill] sm:$0xff] }
 0x29f   : > { %4010 = vmatpush3.msra.mxu0 %v5944_v48  ;;  %4037 = vmatpush3.msra.mxu1 %v6490_v42  ;;  %v6495_v48 = vand.u32 4294901760, %v5753_v35  ;;  %v6496_v42 = vand.u32 4294901760, %v5708_v32  ;;  %v6500_v32 = vand.u32 4294901760, %v5679_v46  ;;  %v6505_v46 = vand.u32 4294901760, %v5663_v41  ;;  %v6523_v35 = vld [vmem:[#allocation11_spill] sm:$0xff] }
 0x2a0   : > { %3208 = vmatmul.mubr.f32.vlgmr.msra.gmra.mxu0 %v6459_v57  ;;  %4038 = vmatprep.subr.mxu1 %v6491_v9  ;;  %v6509_v41 = vand.u32 4294901760, %v5656_v17  ;;  %v6513_v17 = vand.u32 4294901760, %v5672_v2  ;;  %v6517_v2 = vand.u32 4294901760, %v5660_v43 }
 0x2a1   : > { %4049 = vmatprep.subr.mxu0 %v6492_v14  ;;  %4039 = vmatpush3.msra.mxu1 %v6461_v45  ;;  %v6497_v14 = vand.u32 4294901760, %v5721_v25  ;;  %v6502_v25 = vand.u32 4294901760, %v5750_v19  ;;  %v6506_v19 = vand.u32 4294901760, %v5780_v8  ;;  %v6527_v8 = vld [vmem:[#allocation32_spill] sm:$0xff] }
 0x2a2   : > { %4050 = vmatpush3.msra.mxu0 %v6493_v53  ;;  %3482 = vmatprep.mubr.f32.mxu0 %v6494_v26  ;;  %v6498_v53 = vand.u32 4294901760, %v5666_v49  ;;  %v6503_v49 = vand.u32 4294901760, %v5639_v39  ;;  %v6507_v39 = vand.u32 4294901760, %v5636_v1  ;;  %v6511_v1 = vand.u32 4294901760, %v5630_v18 }
 0x2a3   : > { %4040 = vmatprep.subr.mxu1 %v5870_v13  ;;  %4051 = vmatprep.subr.mxu0 %v6495_v48  ;;  %v6515_v18 = vand.u32 4294901760, %v5653_v22  ;;  %v6519_v22 = vand.u32 4294901760, %v6451_v0 }
 0x2a4   : > { %4041 = vmatpush3.msra.mxu1 %v5649_v58  ;;  %4052 = vmatpush3.msra.mxu0 %v6496_v42 }
 0x2a5   : > { %4042 = vmatprep.subr.mxu1 %v5885_v7  ;;  %4053 = vmatprep.subr.mxu0 %v6497_v14 }
 0x2a6   : > { %4043 = vmatpush3.msra.mxu1 %v6455_v30  ;;  %4054 = vmatpush3.msra.mxu0 %v6498_v53 }
 0x2a7   : > { %4044 = vmatprep.subr.mxu1 %v5897_v51  ;;  %4055 = vmatprep.subr.mxu0 %v6499_v20 }
 0x2a8   : > { %4045 = vmatpush3.msra.mxu1 %v6463_v33  ;;  %4056 = vmatpush3.msra.mxu0 %v6500_v32 }
 0x2a9   : > { %3316 = vmatmul.mubr.f32.vlgmr.msra.gmra.mxu1 %v6501_v63  ;;  %4057 = vmatprep.subr.mxu0 %v6502_v25 }
 0x2aa   : > { %4084 = vmatprep.subr.mxu1 %v5723_v40  ;;  %4058 = vmatpush3.msra.mxu0 %v6503_v49  ;;  %v6512_v40 = vand.u32 4294901760, %v5833_v10  ;;  %v6529_v10 = vld [vmem:[#allocation13_spill] sm:$0xff] }
 0x2ab   : > { %4085 = vmatpush3.msra.mxu1 %v5681_v4  ;;  %3586 = vmatprep.mubr.f32.mxu1 %v6494_v26  ;;  %v6508_v4 = vand.u32 4294901760, %v5802_v59  ;;  %v6526_v59 = vand.u32 4294901760, %v6525_v56 }
 0x2ac   : > { %4059 = vmatprep.subr.mxu0 %v6504_v54  ;;  %4086 = vmatprep.subr.mxu1 %v5739_v28  ;;  %v6514_v28 = vand.u32 4294901760, %v5847_v23  ;;  %v6530_v23 = vand.u32 4294901760, %v6529_v10 }
 0x2ad   : > { %4060 = vmatpush3.msra.mxu0 %v6505_v46  ;;  %4087 = vmatpush3.msra.mxu1 %v5688_v36  ;;  %v6510_v36 = vand.u32 4294901760, %v5816_v11  ;;  %v6528_v11 = vand.u32 4294901760, %v5935_v15 }
 0x2ae   : > { %4061 = vmatprep.subr.mxu0 %v6506_v19  ;;  %4088 = vmatprep.subr.mxu1 %v6476_v61 }
 0x2af   : > { %4062 = vmatpush3.msra.mxu0 %v6507_v39  ;;  %4089 = vmatpush3.msra.mxu1 %v6477_v60 }
 0x2b0   : > { %4063 = vmatprep.subr.mxu0 %v6508_v4  ;;  %4090 = vmatprep.subr.mxu1 %v6478_v62 }
 0x2b1   : > { %4064 = vmatpush3.msra.mxu0 %v6509_v41  ;;  %4091 = vmatpush3.msra.mxu1 %v6479_v6 }
 0x2b2   : > { %4065 = vmatprep.subr.mxu0 %v6510_v36  ;;  %4092 = vmatprep.subr.mxu1 %v5718_v16  ;;  %v6518_v16 = vand.u32 4294901760, %v5877_v44  ;;  %v6532_v44 = vld [vmem:[#allocation27_spill] sm:$0xff] }
 0x2b3   : > { %4066 = vmatpush3.msra.mxu0 %v6511_v1  ;;  %4093 = vmatpush3.msra.mxu1 %v5602_v50  ;;  %v6516_v50 = vand.u32 4294901760, %v5862_v37  ;;  %v6531_v37 = vld [vmem:[#allocation34_spill] sm:$0xff] }
 0x2b4   : > { %4067 = vmatprep.subr.mxu0 %v6512_v40  ;;  %4094 = vmatprep.subr.mxu1 %v6480_v12 }
 0x2b5   : > { %4068 = vmatpush3.msra.mxu0 %v6513_v17  ;;  %4095 = vmatpush3.msra.mxu1 %v6481_v3 }
 0x2b6   : > { %4069 = vmatprep.subr.mxu0 %v6514_v28  ;;  %4096 = vmatprep.subr.mxu1 %v5746_v52  ;;  %v6521_v52 = vld [vmem:[#allocation19_spill] sm:$0xff] }
 0x2b7   : > { %4070 = vmatpush3.msra.mxu0 %v6515_v18  ;;  %4097 = vmatpush3.msra.mxu1 %v5600_v34  ;;  %v6520_v34 = vand.u32 4294901760, %v5900_v47  ;;  %v6522_v43 = vand.u32 4294901760, %v6521_v52 }
 0x2b8   : > { %4071 = vmatprep.subr.mxu0 %v6516_v50  ;;  %4098 = vmatprep.subr.mxu1 %v5761_v55  ;;  %v6524_v55 = vand.u32 4294901760, %v6523_v35 }
 0x2b9   : > { %4072 = vmatpush3.msra.mxu0 %v6517_v2  ;;  %4099 = vmatpush3.msra.mxu1 %v6482_v31 }
 0x2ba   : > { %4073 = vmatprep.subr.mxu0 %v6518_v16  ;;  %4100 = vmatprep.subr.mxu1 %v6483_v27 }
 0x2bb   : > { %4074 = vmatpush3.msra.mxu0 %v6519_v22  ;;  %4101 = vmatpush3.msra.mxu1 %v6484_v38 }
 0x2bc   : > { %4075 = vmatprep.subr.mxu0 %v6520_v34  ;;  %4102 = vmatprep.subr.mxu1 %v6485_v21 }
 0x2bd   : > { %4076 = vmatpush3.msra.mxu0 %v6522_v43  ;;  %4103 = vmatpush3.msra.mxu1 %v6486_v29 }
 0x2be   : > { %4077 = vmatprep.subr.mxu0 %v6524_v55  ;;  %4104 = vmatprep.subr.mxu1 %v6487_v5 }
 0x2bf   : > { %4078 = vmatpush3.msra.mxu0 %v6526_v59  ;;  %4105 = vmatpush3.msra.mxu1 %v6527_v8 }
 0x2c0   : > { %4079 = vmatprep.subr.mxu0 %v6528_v11  ;;  %4106 = vmatprep.subr.mxu1 %v6489_v24 }
 0x2c1   : > { %4080 = vmatpush3.msra.mxu0 %v6530_v23  ;;  %4107 = vmatpush3.msra.mxu1 %v6531_v37 }
 0x2c2   : > { %3484 = vmatmul.mubr.f32.vlgmr.msra.gmra.mxu0 %v6532_v44  ;;  %4108 = vmatprep.subr.mxu1 %v6491_v9 }
 0x2c3   : > { %4109 = vmatpush3.msra.mxu1 %v6461_v45 }
 0x2c4   : > { %4110 = vmatprep.subr.mxu1 %v5870_v13 }
 0x2c5   : > { %4111 = vmatpush3.msra.mxu1 %v5649_v58 }
 0x2c6   : > { %4112 = vmatprep.subr.mxu1 %v5885_v7 }
 0x2c7   : > { %4113 = vmatpush3.msra.mxu1 %v6455_v30 }
 0x2c8   : > { %4114 = vmatprep.subr.mxu1 %v5897_v51 }
 0x2c9   : > { %4115 = vmatpush3.msra.mxu1 %v6463_v33 }
 0x2ca   : > { %3588 = vmatmul.mubr.f32.vlgmr.msra.gmra.mxu1 %v6532_v44 }
 0x33e   : > { %v3941_v57 = vpop.f32.mrf.mxu0 }
 0x340   : > { %v3942_v47 = vpop.f32.mrf.mxu0 }
 0x341   : > { %v3943_v24 = vadd.f32 %v3942_v47, %v3941_v57 }
 0x347   : > { %v3976_v0 = vpop.f32.mrf.mxu1 }
 0x349   : > { %v3977_v15 = vpop.f32.mrf.mxu1 }
 0x34a   : > { %v3978_v58 = vadd.f32 %v3977_v15, %v3976_v0 }
 0x34c   : > { %v3072_v51 = vadd.f32 %v3978_v58, %v3943_v24 }
 0x360   : > { %v4011_v9 = vpop.f32.mrf.mxu0 }
 0x362   : > { %v4012_v45 = vpop.f32.mrf.mxu0 }
 0x363   : > { %v4013_v30 = vadd.f32 %v4012_v45, %v4011_v9 }
 0x365   : > { %v3210_v33 = vadd.f32 %v4013_v30, %v3072_v51 }
 0x369   : > { %v4046_v48 = vpop.f32.mrf.mxu1 }
 0x36b   : > { %v4047_v7 = vpop.f32.mrf.mxu1 }
 0x36c   : > { %v4048_v61 = vadd.f32 %v4047_v7, %v4046_v48 }
 0x36e   : > { %v3318_v6 = vadd.f32 %v4048_v61, %v3210_v33 }
 0x382   : > { %v4081_v13 = vpop.f32.mrf.mxu0 }
 0x384   : > { %v4082_v42 = vpop.f32.mrf.mxu0 }
 0x385   : > { %v4083_v60 = vadd.f32 %v4082_v42, %v4081_v13 }
 0x387   : > { %v3486_v3 = vadd.f32 %v4083_v60, %v3318_v6 }
 0x38a   : > { %v4116_v62 = vpop.f32.mrf.mxu1 }
 0x38c   : > { %v4117_v12 = vpop.f32.mrf.mxu1 }
 0x38d   : > { %v4118_v31 = vadd.f32 %v4117_v12, %v4116_v62 }
 0x38f   : > { %v3590_v27 = vadd.f32 %v4118_v31, %v3486_v3 }
 0x391   : > { %v3599_v38 = vmax.f32 %v3590_v27, 0.0 }
 0x393   : > { %3600 = vst [vmem:[%s229_s14] sm:$0xff] %v3599_v38 }
 0x394   : > { %4535 = shalt.err (!%p4532_p3)
}
 0x395   : > { %s4536_s5 = scalar_lea.hbm %s3613_s26, 128  ;;  %s4540_s10 = scalar_lea.hbm %s6198_s4, 256 }
 0x396   : > { %p4537_p5 = scmp.ne.s32.totalorder %s3613_s26, %s4536_s5  ;;  %p4541_p10 = scmp.lt.s32.totalorder %s3613_s26, %s6198_s4 }
 0x397   : > { %p4542_p4 = scmp.lt.s32.totalorder %s4540_s10, %s4536_s5 }
 0x398   : > { %p4538_p6 = pnand %p4537_p5, %p4684_p9 }
 0x399   : > { %p4543_p13 = por %p4542_p4, %p4541_p10 }
 0x39a   : > { %p4539_p7 = pneg %p4538_p6 }
 0x39c   : > { %p4544_p8 = pnand %p4543_p13, %p4539_p7 }
 0x39e   : > { %4547 = shalt.err (!%p4544_p8)
}
 0x39f   : > { %4421 = dma.vmem_to_hbm [thread:$0]  (%p4684_p9), %s3616_s21, 128, %s3613_s26, %s3602_s6  }
 0x3a0 PF: > { %s3627_s13 = sand.u32 1, %s4582_s15   ;;  %p6533_p11 = scmp.ne.s32.totalorder %s6309_s30, 0 }
 0x3a1   : > { %p6534_p12 = scmp.ge.s32.totalorder %s4602_s20, 2  ;;  %s3628_s14 = scalar_lea.sflag [#allocation5], %s3627_s13 }
 0x3a3   : > { %p4428_p0 = pnand %p6534_p12, %p6533_p11 }
 0x3a5   : > { %p4429_p1 = pneg %p4428_p0 }
 0x3a7   : > { %4577 = dma.done.wait (%p4429_p1), %s3628_s14, 128  }
 0x3a8   : > { %4579 = vsyncadd (%p4429_p1), %s3628_s14, 4294967168  ;;  %s20_s20 = sadd.s32 1, %s4602_s20   ;;  %s6535_s15 = smov %s4586_s16 }
 0x3a9   : > { %p17_p2 = scmp.ge.s32.totalorder %s20_s20, 4   ;;  %s6536_s16 = smov %s4590_s17 }
 0x3aa   : > { %s6537_s17 = smov %s4689_s29  ;;  %s6538_s18 = smov %s4598_s19 }
 0x3ab   : > { %s6539_s19 = smov %s6541_s23  ;;  %19 = sbr.rel (!%p17_p2) target bundleno = 6 (0x6), region = 89 }
 0x3b0   :  { %3633 = vsyncpa [#allocation4], 1 }
 0x3b1   :  { %3635 = vsyncpa [#allocation4 + $0x1], 1 }
 0x3b2   :  { %3636 = vsyncpa [#allocation5], 1 }
 0x3b3   :  { %3638 = vsyncpa [#allocation5 + $0x1], 1 }

</bundles_post_ra>
